<compile_context>
chip_gen: v6e
topology: v6e:2x2x1
jax: 0.10.0
libtpu: 0.0.40
codegen_flags: <defaults>
</compile_context>

<pallas_src>
import functools
import math

import jax
import jax.numpy as jnp
from jax.experimental import pallas as pl
from jax.experimental.pallas import tpu as pltpu

# 512 tiles sit at ~85% of the measured HBM-roofline curve and are multiples
# of 128 (v5e MXU) and 256 (v6e/v7x MXU).  Worst-case per-step VMEM
# (FF2 + fused LN, tm=512, K=3072) is ~20 MiB, under the explicit limit below.
TILE_M = 512          # matmul row tile over B*S rows
TILE_N = 512          # matmul output-column tile
TILE_S = 256          # attention q tile
VMEM_LIMIT = 48 * 1024 * 1024


def _round_up(x, m):
    return (x + m - 1) // m * m


def _pick_tile(n, target, align):
    """Return (tile, padded_n): whole dim if small, else `target` + padding."""
    if n <= target:
        return n, n
    assert target % align == 0
    return target, _round_up(n, target)


def _apply_activation(y, activation):
    if activation == "relu":
        return jnp.maximum(y, 0.0)
    if activation == "gelu":
        # tanh-approximation GELU.
        # TODO(synk): HF DistilBERT uses exact erf-based GELU; switch if
        # lax.erf lowering is available in the Mosaic build in use.
        c = math.sqrt(2.0 / math.pi)
        return 0.5 * y * (1.0 + jnp.tanh(c * (y + 0.044715 * y * y * y)))
    return y


# ----------------------------- Pallas kernels ------------------------------

def _linear_kernel(x_ref, w_ref, b_ref, o_ref, *, activation):
    """y = x @ W + b with full-K blocks (no reduction grid axis)."""
    y = jnp.dot(x_ref[...], w_ref[...], preferred_element_type=jnp.float32)
    y = _apply_activation(y + b_ref[...], activation)
    o_ref[...] = y.astype(o_ref.dtype)


def _linear_add_ln_kernel(x_ref, w_ref, b_ref, r_ref, g_ref, beta_ref, o_ref,
                          *, eps):
    """Fused: LayerNorm((x @ W + b) + residual) * gamma + beta (full-N block)."""
    y = jnp.dot(x_ref[...], w_ref[...], preferred_element_type=jnp.float32)
    y = y + b_ref[...] + r_ref[...].astype(jnp.float32)
    mean = jnp.mean(y, axis=-1, keepdims=True)
    var = jnp.mean(jnp.square(y - mean), axis=-1, keepdims=True)
    y = (y - mean) * jax.lax.rsqrt(var + eps)
    o_ref[...] = (y * g_ref[...] + beta_ref[...]).astype(o_ref.dtype)


def _layernorm_kernel(x_ref, g_ref, b_ref, o_ref, *, eps):
    x = x_ref[...].astype(jnp.float32)
    mean = jnp.mean(x, axis=-1, keepdims=True)
    var = jnp.mean(jnp.square(x - mean), axis=-1, keepdims=True)
    y = (x - mean) * jax.lax.rsqrt(var + eps)
    o_ref[...] = (y * g_ref[...] + b_ref[...]).astype(o_ref.dtype)


def _qkv_kernel(x_ref, wq_ref, wk_ref, wv_ref, bq_ref, bk_ref, bv_ref,
                q_ref, k_ref, v_ref):
    """Fused Q/K/V projection: x block read once, three full-K matmuls."""
    x = x_ref[...]
    for w_ref, b_ref, o_ref in ((wq_ref, bq_ref, q_ref),
                                (wk_ref, bk_ref, k_ref),
                                (wv_ref, bv_ref, v_ref)):
        y = jnp.dot(x, w_ref[...], preferred_element_type=jnp.float32)
        o_ref[...] = (y + b_ref[...]).astype(o_ref.dtype)


def _attn_kernel(q_ref, k_ref, v_ref, m_ref, o_ref, *, n_heads, scale):
    """Per (batch, q_tile) attention over the FULL kv range, all heads.

    q_ref: (tq, D); k_ref/v_ref: (Skv, D); m_ref: (1, Skv); o_ref: (tq, D).
    Heads are sliced out of the full-D (lane-dense) blocks inside the kernel,
    so no head transpose ever touches HBM and the output store is lane-dense.
    """
    # TODO(synk): for sequences much longer than 512, re-introduce a streamed
    # (online-softmax) kv axis; at DistilBERT's max S=512 full-kv is cheaper.
    q = q_ref[...]
    k = k_ref[...]
    v = v_ref[...]
    mask = m_ref[...]                                  # (1, Skv) additive
    dh = q.shape[-1] // n_heads

    outs = []
    for h in range(n_heads):
        sl = slice(h * dh, (h + 1) * dh)
        qh = q[:, sl] * scale                          # fold scale into q (bf16)
        s = jax.lax.dot_general(qh, k[:, sl],
                                (((1,), (1,)), ((), ())),
                                preferred_element_type=jnp.float32)
        s = s + mask                                   # (tq, Skv)
        s_max = jnp.max(s, axis=-1, keepdims=True)
        p = jnp.exp(s - s_max)
        denom = jnp.sum(p, axis=-1, keepdims=True)
        ctx = jax.lax.dot_general(p.astype(v.dtype), v[:, sl],
                                  (((1,), (0,)), ((), ())),
                                  preferred_element_type=jnp.float32)
        outs.append(ctx * pl.reciprocal(denom, approx=True))
    o_ref[...] = jnp.concatenate(outs, axis=-1).astype(o_ref.dtype)


# ------------------------------ Pallas wrappers ------------------------------

def pallas_linear(x, w_t, b, activation="none", out_dtype=jnp.bfloat16):
    """x: (M, K); w_t: (K, N) bf16 (pre-transposed); b: (N,). Full-K blocks."""
    M, K = x.shape
    Kw, N = w_t.shape
    assert K == Kw
    tm, Mp = _pick_tile(M, TILE_M, 8)
    tn, Np = _pick_tile(N, TILE_N, 128)

    x = x.astype(jnp.bfloat16)
    if Mp != M:
        x = jnp.pad(x, ((0, Mp - M), (0, 0)))
    b2 = b.reshape(1, N).astype(jnp.float32)
    if Np != N:
        w_t = jnp.pad(w_t, ((0, 0), (0, Np - N)))
        b2 = jnp.pad(b2, ((0, 0), (0, Np - N)))

    out = pl.pallas_call(
        functools.partial(_linear_kernel, activation=activation),
        out_shape=jax.ShapeDtypeStruct((Mp, Np), out_dtype),
        grid_spec=pltpu.PrefetchScalarGridSpec(
            num_scalar_prefetch=0,
            grid=(Mp // tm, Np // tn),
            in_specs=[
                pl.BlockSpec((tm, K), lambda i, j: (i, 0)),
                pl.BlockSpec((K, tn), lambda i, j: (0, j)),
                pl.BlockSpec((1, tn), lambda i, j: (0, j)),
            ],
            out_specs=pl.BlockSpec((tm, tn), lambda i, j: (i, j)),
        ),
        compiler_params=pltpu.CompilerParams(
            dimension_semantics=("parallel", "parallel"),
            vmem_limit_bytes=VMEM_LIMIT),
    )(x, w_t, b2)
    return out[:M, :N]


def pallas_linear_residual_ln(x, w_t, b, residual, gamma, beta, eps=1e-12,
                              out_dtype=jnp.bfloat16):
    """LayerNorm(x @ W + b + residual): full-K, full-N(=D) blocks, M tiled."""
    M, K = x.shape
    _, N = w_t.shape
    tm, Mp = _pick_tile(M, TILE_M, 8)

    x = x.astype(jnp.bfloat16)
    residual = residual.astype(jnp.bfloat16)
    if Mp != M:
        x = jnp.pad(x, ((0, Mp - M), (0, 0)))
        residual = jnp.pad(residual, ((0, Mp - M), (0, 0)))
    b2 = b.reshape(1, N).astype(jnp.float32)
    g2 = gamma.reshape(1, N).astype(jnp.float32)
    be2 = beta.reshape(1, N).astype(jnp.float32)

    out = pl.pallas_call(
        functools.partial(_linear_add_ln_kernel, eps=eps),
        out_shape=jax.ShapeDtypeStruct((Mp, N), out_dtype),
        grid_spec=pltpu.PrefetchScalarGridSpec(
            num_scalar_prefetch=0,
            grid=(Mp // tm,),
            in_specs=[
                pl.BlockSpec((tm, K), lambda i: (i, 0)),
                pl.BlockSpec((K, N), lambda i: (0, 0)),
                pl.BlockSpec((1, N), lambda i: (0, 0)),
                pl.BlockSpec((tm, N), lambda i: (i, 0)),
                pl.BlockSpec((1, N), lambda i: (0, 0)),
                pl.BlockSpec((1, N), lambda i: (0, 0)),
            ],
            out_specs=pl.BlockSpec((tm, N), lambda i: (i, 0)),
        ),
        compiler_params=pltpu.CompilerParams(
            dimension_semantics=("parallel",),
            vmem_limit_bytes=VMEM_LIMIT),
    )(x, w_t, b2, residual, g2, be2)
    return out[:M]


def pallas_layernorm(x, gamma, beta, eps=1e-12, out_dtype=jnp.bfloat16):
    """Row-tiled LayerNorm (used once, on the embeddings)."""
    M, D = x.shape
    tm, Mp = _pick_tile(M, TILE_M, 8)
    if Mp != M:
        x = jnp.pad(x, ((0, Mp - M), (0, 0)))
    g = gamma.reshape(1, D).astype(jnp.float32)
    b = beta.reshape(1, D).astype(jnp.float32)

    out = pl.pallas_call(
        functools.partial(_layernorm_kernel, eps=eps),
        out_shape=jax.ShapeDtypeStruct((Mp, D), out_dtype),
        grid_spec=pltpu.PrefetchScalarGridSpec(
            num_scalar_prefetch=0,
            grid=(Mp // tm,),
            in_specs=[
                pl.BlockSpec((tm, D), lambda i: (i, 0)),
                pl.BlockSpec((1, D), lambda i: (0, 0)),
                pl.BlockSpec((1, D), lambda i: (0, 0)),
            ],
            out_specs=pl.BlockSpec((tm, D), lambda i: (i, 0)),
        ),
        compiler_params=pltpu.CompilerParams(
            dimension_semantics=("parallel",),
            vmem_limit_bytes=VMEM_LIMIT),
    )(x, g, b)
    return out[:M]


def pallas_qkv(x, wq_t, wk_t, wv_t, bq, bk, bv):
    """Fused QKV projection with three separate (M, D) bf16 outputs."""
    M, K = x.shape
    D = wq_t.shape[1]
    tm, Mp = _pick_tile(M, TILE_M, 8)
    x = x.astype(jnp.bfloat16)
    if Mp != M:
        x = jnp.pad(x, ((0, Mp - M), (0, 0)))
    bq2 = bq.reshape(1, D).astype(jnp.float32)
    bk2 = bk.reshape(1, D).astype(jnp.float32)
    bv2 = bv.reshape(1, D).astype(jnp.float32)

    w_spec = pl.BlockSpec((K, D), lambda i: (0, 0))
    b_spec = pl.BlockSpec((1, D), lambda i: (0, 0))
    o_spec = pl.BlockSpec((tm, D), lambda i: (i, 0))

    q, k, v = pl.pallas_call(
        _qkv_kernel,
        out_shape=tuple(jax.ShapeDtypeStruct((Mp, D), jnp.bfloat16)
                        for _ in range(3)),
        grid_spec=pltpu.PrefetchScalarGridSpec(
            num_scalar_prefetch=0,
            grid=(Mp // tm,),
            in_specs=[pl.BlockSpec((tm, K), lambda i: (i, 0)),
                      w_spec, w_spec, w_spec, b_spec, b_spec, b_spec],
            out_specs=[o_spec, o_spec, o_spec],
        ),
        compiler_params=pltpu.CompilerParams(
            dimension_semantics=("parallel",),
            vmem_limit_bytes=VMEM_LIMIT),
    )(x, wq_t, wk_t, wv_t, bq2, bk2, bv2)
    return q[:M], k[:M], v[:M]


def pallas_attention(q, k, v, add_mask, scale, n_heads):
    """q, k, v: (B, S, D) bf16; add_mask: (B, 1, S) additive (0 / -1e9)."""
    B, S, D = q.shape
    tq, Sp = _pick_tile(S, TILE_S, 8)
    if Sp != S:
        pad = Sp - S
        q = jnp.pad(q, ((0, 0), (0, pad), (0, 0)))
        k = jnp.pad(k, ((0, 0), (0, pad), (0, 0)))
        v = jnp.pad(v, ((0, 0), (0, pad), (0, 0)))
        add_mask = jnp.pad(add_mask, ((0, 0), (0, 0), (0, pad)),
                           constant_values=-1e9)

    out = pl.pallas_call(
        functools.partial(_attn_kernel, n_heads=n_heads, scale=scale),
        out_shape=jax.ShapeDtypeStruct((B, Sp, D), jnp.bfloat16),
        grid_spec=pltpu.PrefetchScalarGridSpec(
            num_scalar_prefetch=0,
            grid=(B, Sp // tq),
            in_specs=[
                pl.BlockSpec((None, tq, D), lambda b, qi: (b, qi, 0)),
                pl.BlockSpec((None, Sp, D), lambda b, qi: (b, 0, 0)),
                pl.BlockSpec((None, Sp, D), lambda b, qi: (b, 0, 0)),
                pl.BlockSpec((None, 1, Sp), lambda b, qi: (b, 0, 0)),
            ],
            out_specs=pl.BlockSpec((None, tq, D), lambda b, qi: (b, qi, 0)),
        ),
        compiler_params=pltpu.CompilerParams(
            dimension_semantics=("parallel", "parallel"),
            vmem_limit_bytes=VMEM_LIMIT),
    )(q, k, v, add_mask)
    return out[:, :S, :]


# --------------------------- parameter creation -----------------------------

def init_params(key, cfg):
    """Parameters in PyTorch Linear layout (out_features, in_features), f32."""
    D, FF = cfg["dim"], cfg["hidden_dim"]

    def dense(k, out_f, in_f):
        return (0.02 * jax.random.normal(k, (out_f, in_f), jnp.float32),
                jnp.zeros((out_f,), jnp.float32))

    keys = jax.random.split(key, 4 + cfg["n_layers"])
    params = {
        "word_emb": 0.02 * jax.random.normal(
            keys[0], (cfg["vocab_size"], D), jnp.float32),
        "pos_emb": 0.02 * jax.random.normal(
            keys[1], (cfg["max_position_embeddings"], D), jnp.float32),
        "emb_ln_g": jnp.ones((D,), jnp.float32),
        "emb_ln_b": jnp.zeros((D,), jnp.float32),
        "layers": [],
    }
    for li in range(cfg["n_layers"]):
        lk = jax.random.split(keys[2 + li], 6)
        qw, qb = dense(lk[0], D, D)
        kw, kb = dense(lk[1], D, D)
        vw, vb = dense(lk[2], D, D)
        ow, ob = dense(lk[3], D, D)
        f1w, f1b = dense(lk[4], FF, D)
        f2w, f2b = dense(lk[5], D, FF)
        params["layers"].append(dict(
            q_w=qw, q_b=qb, k_w=kw, k_b=kb, v_w=vw, v_b=vb, o_w=ow, o_b=ob,
            sa_ln_g=jnp.ones((D,), jnp.float32),
            sa_ln_b=jnp.zeros((D,), jnp.float32),
            ff1_w=f1w, ff1_b=f1b, ff2_w=f2w, ff2_b=f2b,
            out_ln_g=jnp.ones((D,), jnp.float32),
            out_ln_b=jnp.zeros((D,), jnp.float32),
        ))
    pre_w, pre_b = dense(keys[-2], D, D)
    cls_w, cls_b = dense(keys[-1], cfg["num_classes"], D)
    params.update(pre_w=pre_w, pre_b=pre_b, cls_w=cls_w, cls_b=cls_b)
    return params


def prepare_params(params):
    """One-time prep: transpose weights to (K, N) and cast to bf16."""
    def wt(w):
        return jnp.asarray(w.T, jnp.bfloat16)

    prepped = dict(
        word_emb=params["word_emb"],
        pos_emb=params["pos_emb"],
        emb_ln_g=params["emb_ln_g"], emb_ln_b=params["emb_ln_b"],
        pre_wt=wt(params["pre_w"]), pre_b=params["pre_b"],
        cls_wt=wt(params["cls_w"]), cls_b=params["cls_b"],
        layers=[],
    )
    for lyr in params["layers"]:
        prepped["layers"].append(dict(
            q_wt=wt(lyr["q_w"]), q_b=lyr["q_b"],
            k_wt=wt(lyr["k_w"]), k_b=lyr["k_b"],
            v_wt=wt(lyr["v_w"]), v_b=lyr["v_b"],
            o_wt=wt(lyr["o_w"]), o_b=lyr["o_b"],
            sa_ln_g=lyr["sa_ln_g"], sa_ln_b=lyr["sa_ln_b"],
            ff1_wt=wt(lyr["ff1_w"]), ff1_b=lyr["ff1_b"],
            ff2_wt=wt(lyr["ff2_w"]), ff2_b=lyr["ff2_b"],
            out_ln_g=lyr["out_ln_g"], out_ln_b=lyr["out_ln_b"],
        ))
    return prepped


# ------------------------------ forward pass --------------------------------

def distilbert_classifier_forward(params, input_ids, attention_mask, cfg):
    B, S = input_ids.shape
    D, H = cfg["dim"], cfg["n_heads"]
    Dh = D // H
    scale = 1.0 / math.sqrt(Dh)

    # Embeddings (gather is glue) + embedding LayerNorm (Pallas) -> bf16.
    we = jnp.take(params["word_emb"], input_ids, axis=0)            # (B, S, D)
    pe = params["pos_emb"][:S]                                      # (S, D)
    h = (we + pe[None, :, :]).reshape(B * S, D)
    h = pallas_layernorm(h, params["emb_ln_g"], params["emb_ln_b"])

    # Additive mask: 0 where attended, -1e9 where masked.
    if attention_mask is None:
        attention_mask = jnp.ones((B, S), jnp.float32)
    add_mask = (1.0 - attention_mask.astype(jnp.float32)) * -1e9    # (B, S)
    add_mask = add_mask[:, None, :]                                 # (B, 1, S)

    for layer in params["layers"]:
        x = h                                                       # (B*S, D) bf16
        q, k, v = pallas_qkv(x, layer["q_wt"], layer["k_wt"], layer["v_wt"],
                             layer["q_b"], layer["k_b"], layer["v_b"])
        q = q.reshape(B, S, D)
        k = k.reshape(B, S, D)
        v = v.reshape(B, S, D)
        ctx = pallas_attention(q, k, v, add_mask, scale, H)         # (B, S, D)
        ctx = ctx.reshape(B * S, D)
        # O-proj + residual + LayerNorm fused in one kernel.
        h = pallas_linear_residual_ln(ctx, layer["o_wt"], layer["o_b"],
                                      residual=x,
                                      gamma=layer["sa_ln_g"],
                                      beta=layer["sa_ln_b"])
        ff = pallas_linear(h, layer["ff1_wt"], layer["ff1_b"],
                           activation="gelu")
        # FF2 + residual + LayerNorm fused in one kernel.
        h = pallas_linear_residual_ln(ff, layer["ff2_wt"], layer["ff2_b"],
                                      residual=h,
                                      gamma=layer["out_ln_g"],
                                      beta=layer["out_ln_b"])

    h = h.reshape(B, S, D)
    pooled = h[:, 0]                                                # (B, D)
    pooled = pallas_linear(pooled, params["pre_wt"], params["pre_b"],
                           activation="relu")                       # pre_classifier + ReLU
    # nn.Dropout in eval mode is the identity (inference semantics).
    logits = pallas_linear(pooled, params["cls_wt"], params["cls_b"],
                           out_dtype=jnp.float32)
    return logits


# ---------------------------------- main -------------------------------------

if __name__ == "__main__":
    cfg = dict(
        vocab_size=100,
        max_position_embeddings=16,
        dim=32,
        n_heads=2,
        hidden_dim=64,
        n_layers=2,
        num_classes=3,
    )
    B, S = 2, 8

    root = jax.random.PRNGKey(0)
    k_params, k_ids = jax.random.split(root)
    params = prepare_params(init_params(k_params, cfg))
    input_ids = jax.random.randint(k_ids, (B, S), 0, cfg["vocab_size"],
                                   dtype=jnp.int32)
    attention_mask = jnp.ones((B, S), jnp.float32)

    fwd = jax.jit(functools.partial(distilbert_classifier_forward, cfg=cfg))
    logits = fwd(params, input_ids, attention_mask)
    logits = jax.block_until_ready(logits)
    assert logits.shape == (B, cfg["num_classes"])
    assert bool(jnp.all(jnp.isfinite(logits)))
    print("KERNEL_OK")
</pallas_src>

<mosaic_0001>
module attributes {stable_mosaic.version = 11 : i64} {
  func.func @_layernorm_kernel(%arg0: i32, %arg1: memref<16x32xf32, #tpu.memory_space<vmem>>, %arg2: memref<1x32xf32, #tpu.memory_space<vmem>>, %arg3: memref<1x32xf32, #tpu.memory_space<vmem>>, %arg4: memref<16x32xbf16, #tpu.memory_space<vmem>>) attributes {dimension_semantics = [#tpu.dimension_semantics<parallel>], iteration_bounds = array<i64: 1>, scalar_prefetch = 0 : i64, scratch_operands = 0 : i64, tpu.core_type = #tpu.core_type<tc>, window_params = [{transform_indices = @transform_0, window_bounds = array<i64: 16, 32>}, {pipeline_mode = #tpu.pipeline_mode<synchronous>, transform_indices = @transform_1, window_bounds = array<i64: 1, 32>}, {pipeline_mode = #tpu.pipeline_mode<synchronous>, transform_indices = @transform_2, window_bounds = array<i64: 1, 32>}, {transform_indices = @transform_3, window_bounds = array<i64: 16, 32>}]} {
    %c0 = arith.constant 0 : index
    %c0_0 = arith.constant 0 : index
    %0 = vector.load %arg1[%c0, %c0_0] : memref<16x32xf32, #tpu.memory_space<vmem>>, vector<16x32xf32>
    %cst = arith.constant dense<0.000000e+00> : vector<16xf32>
    %1 = vector.multi_reduction <add>, %0, %cst [1] : vector<16x32xf32> to vector<16xf32>
    %2 = vector.shape_cast %1 : vector<16xf32> to vector<16x1xf32>
    %cst_1 = arith.constant 3.200000e+01 : f32
    %3 = vector.broadcast %cst_1 : f32 to vector<16x1xf32>
    %4 = arith.divf %2, %3 : vector<16x1xf32>
    %5 = vector.broadcast %4 : vector<16x1xf32> to vector<16x32xf32>
    %6 = arith.subf %0, %5 : vector<16x32xf32>
    %7 = arith.mulf %6, %6 : vector<16x32xf32>
    %cst_2 = arith.constant dense<0.000000e+00> : vector<16xf32>
    %8 = vector.multi_reduction <add>, %7, %cst_2 [1] : vector<16x32xf32> to vector<16xf32>
    %9 = vector.shape_cast %8 : vector<16xf32> to vector<16x1xf32>
    %cst_3 = arith.constant 3.200000e+01 : f32
    %10 = vector.broadcast %cst_3 : f32 to vector<16x1xf32>
    %11 = arith.divf %9, %10 : vector<16x1xf32>
    %12 = vector.broadcast %4 : vector<16x1xf32> to vector<16x32xf32>
    %13 = arith.subf %0, %12 : vector<16x32xf32>
    %cst_4 = arith.constant 9.99999996E-13 : f32
    %14 = vector.broadcast %cst_4 : f32 to vector<16x1xf32>
    %15 = arith.addf %11, %14 : vector<16x1xf32>
    %16 = math.rsqrt %15 : vector<16x1xf32>
    %17 = vector.broadcast %16 : vector<16x1xf32> to vector<16x32xf32>
    %18 = arith.mulf %13, %17 : vector<16x32xf32>
    %c0_5 = arith.constant 0 : index
    %c0_6 = arith.constant 0 : index
    %19 = vector.load %arg2[%c0_5, %c0_6] : memref<1x32xf32, #tpu.memory_space<vmem>>, vector<1x32xf32>
    %20 = vector.broadcast %19 : vector<1x32xf32> to vector<16x32xf32>
    %21 = arith.mulf %18, %20 : vector<16x32xf32>
    %c0_7 = arith.constant 0 : index
    %c0_8 = arith.constant 0 : index
    %22 = vector.load %arg3[%c0_7, %c0_8] : memref<1x32xf32, #tpu.memory_space<vmem>>, vector<1x32xf32>
    %23 = vector.broadcast %22 : vector<1x32xf32> to vector<16x32xf32>
    %24 = arith.addf %21, %23 : vector<16x32xf32>
    %25 = arith.truncf %24 : vector<16x32xf32> to vector<16x32xbf16>
    %c0_9 = arith.constant 0 : index
    %c0_10 = arith.constant 0 : index
    %26 = vector.load %arg4[%c0_9, %c0_10] : memref<16x32xbf16, #tpu.memory_space<vmem>>, vector<16x32xbf16>
    tpu.vector_store %arg4[%c0_9, %c0_10], %25 {strides = array<i32>} : memref<16x32xbf16, #tpu.memory_space<vmem>>, vector<16x32xbf16>,
    return
  }
  func.func @transform_0(%arg0: i32) -> (i32, i32) {
    %c0_i32 = arith.constant 0 : i32
    %c0_i32_0 = arith.constant 0 : i32
    return %arg0, %c0_i32 : i32, i32
  }
  func.func @transform_1(%arg0: i32) -> (i32, i32) {
    %c0_i32 = arith.constant 0 : i32
    %c0_i32_0 = arith.constant 0 : i32
    %c0_i32_1 = arith.constant 0 : i32
    return %c0_i32, %c0_i32_0 : i32, i32
  }
  func.func @transform_2(%arg0: i32) -> (i32, i32) {
    %c0_i32 = arith.constant 0 : i32
    %c0_i32_0 = arith.constant 0 : i32
    %c0_i32_1 = arith.constant 0 : i32
    return %c0_i32, %c0_i32_0 : i32, i32
  }
  func.func @transform_3(%arg0: i32) -> (i32, i32) {
    %c0_i32 = arith.constant 0 : i32
    %c0_i32_0 = arith.constant 0 : i32
    return %arg0, %c0_i32 : i32, i32
  }
}

module attributes {stable_mosaic.version = 11 : i64} {
  func.func @_attn_kernel(%arg0: i32, %arg1: i32, %arg2: memref<1x8x32xbf16, #tpu.memory_space<vmem>>, %arg3: memref<1x8x32xbf16, #tpu.memory_space<vmem>>, %arg4: memref<1x8x32xbf16, #tpu.memory_space<vmem>>, %arg5: memref<1x1x8xf32, #tpu.memory_space<vmem>>, %arg6: memref<1x8x32xbf16, #tpu.memory_space<vmem>>) attributes {dimension_semantics = [#tpu.dimension_semantics<parallel>, #tpu.dimension_semantics<parallel>], iteration_bounds = array<i64: 2, 1>, scalar_prefetch = 0 : i64, scratch_operands = 0 : i64, tpu.core_type = #tpu.core_type<tc>, window_params = [{transform_indices = @transform_0, window_bounds = array<i64: 1, 8, 32>}, {transform_indices = @transform_1, window_bounds = array<i64: 1, 8, 32>}, {transform_indices = @transform_2, window_bounds = array<i64: 1, 8, 32>}, {transform_indices = @transform_3, window_bounds = array<i64: 1, 1, 8>}, {transform_indices = @transform_4, window_bounds = array<i64: 1, 8, 32>}]} {
    %c0 = arith.constant 0 : index
    %c0_0 = arith.constant 0 : index
    %c0_1 = arith.constant 0 : index
    %0 = vector.load %arg2[%c0, %c0_0, %c0_1] : memref<1x8x32xbf16, #tpu.memory_space<vmem>>, vector<1x8x32xbf16>
    %1 = vector.shape_cast %0 : vector<1x8x32xbf16> to vector<8x32xbf16>
    %c0_2 = arith.constant 0 : index
    %c0_3 = arith.constant 0 : index
    %c0_4 = arith.constant 0 : index
    %2 = vector.load %arg3[%c0_2, %c0_3, %c0_4] : memref<1x8x32xbf16, #tpu.memory_space<vmem>>, vector<1x8x32xbf16>
    %3 = vector.shape_cast %2 : vector<1x8x32xbf16> to vector<8x32xbf16>
    %c0_5 = arith.constant 0 : index
    %c0_6 = arith.constant 0 : index
    %c0_7 = arith.constant 0 : index
    %4 = vector.load %arg4[%c0_5, %c0_6, %c0_7] : memref<1x8x32xbf16, #tpu.memory_space<vmem>>, vector<1x8x32xbf16>
    %5 = vector.shape_cast %4 : vector<1x8x32xbf16> to vector<8x32xbf16>
    %c0_8 = arith.constant 0 : index
    %c0_9 = arith.constant 0 : index
    %c0_10 = arith.constant 0 : index
    %6 = vector.load %arg5[%c0_8, %c0_9, %c0_10] : memref<1x1x8xf32, #tpu.memory_space<vmem>>, vector<1x1x8xf32>
    %7 = vector.shape_cast %6 : vector<1x1x8xf32> to vector<1x8xf32>
    %8 = vector.extract_strided_slice %1 {offsets = [0, 0], sizes = [8, 16], strides = [1, 1]} : vector<8x32xbf16> to vector<8x16xbf16>
    %cst = arith.constant 2.500000e-01 : bf16
    %9 = vector.broadcast %cst : bf16 to vector<8x16xbf16>
    %10 = arith.mulf %8, %9 : vector<8x16xbf16>
    %11 = vector.extract_strided_slice %3 {offsets = [0, 0], sizes = [8, 16], strides = [1, 1]} : vector<8x32xbf16> to vector<8x16xbf16>
    %cst_11 = arith.constant dense<0.000000e+00> : vector<8x8xf32>
    %12 = tpu.matmul %10, %11, %cst_11 {dimension_numbers = #tpu.dot_dimension_numbers<[1], [1], [0], [0], [0, 0, 1, 0], [], []>} : vector<8x16xbf16>, vector<8x16xbf16>, vector<8x8xf32> -> vector<8x8xf32>
    %13 = vector.broadcast %7 : vector<1x8xf32> to vector<8x8xf32>
    %14 = arith.addf %12, %13 : vector<8x8xf32>
    %cst_12 = arith.constant dense<0xFF800000> : vector<8xf32>
    %15 = vector.multi_reduction <maximumf>, %14, %cst_12 [1] : vector<8x8xf32> to vector<8xf32>
    %16 = vector.shape_cast %15 : vector<8xf32> to vector<8x1xf32>
    %17 = vector.broadcast %16 : vector<8x1xf32> to vector<8x8xf32>
    %18 = arith.subf %14, %17 : vector<8x8xf32>
    %19 = math.exp %18 : vector<8x8xf32>
    %cst_13 = arith.constant dense<0.000000e+00> : vector<8xf32>
    %20 = vector.multi_reduction <add>, %19, %cst_13 [1] : vector<8x8xf32> to vector<8xf32>
    %21 = vector.shape_cast %20 : vector<8xf32> to vector<8x1xf32>
    %22 = arith.truncf %19 : vector<8x8xf32> to vector<8x8xbf16>
    %23 = vector.extract_strided_slice %5 {offsets = [0, 0], sizes = [8, 16], strides = [1, 1]} : vector<8x32xbf16> to vector<8x16xbf16>
    %cst_14 = arith.constant dense<0.000000e+00> : vector<8x16xf32>
    %24 = tpu.matmul %22, %23, %cst_14 {dimension_numbers = #tpu.dot_dimension_numbers<[1], [0], [0], [1], [0, 0, 1, 1], [], []>} : vector<8x8xbf16>, vector<8x16xbf16>, vector<8x16xf32> -> vector<8x16xf32>
    %25 = tpu.reciprocal %21 {approx = true} : vector<8x1xf32> -> vector<8x1xf32>
    %26 = vector.broadcast %25 : vector<8x1xf32> to vector<8x16xf32>
    %27 = arith.mulf %24, %26 : vector<8x16xf32>
    %28 = vector.extract_strided_slice %1 {offsets = [0, 16], sizes = [8, 16], strides = [1, 1]} : vector<8x32xbf16> to vector<8x16xbf16>
    %cst_15 = arith.constant 2.500000e-01 : bf16
    %29 = vector.broadcast %cst_15 : bf16 to vector<8x16xbf16>
    %30 = arith.mulf %28, %29 : vector<8x16xbf16>
    %31 = vector.extract_strided_slice %3 {offsets = [0, 16], sizes = [8, 16], strides = [1, 1]} : vector<8x32xbf16> to vector<8x16xbf16>
    %cst_16 = arith.constant dense<0.000000e+00> : vector<8x8xf32>
    %32 = tpu.matmul %30, %31, %cst_16 {dimension_numbers = #tpu.dot_dimension_numbers<[1], [1], [0], [0], [0, 0, 1, 0], [], []>} : vector<8x16xbf16>, vector<8x16xbf16>, vector<8x8xf32> -> vector<8x8xf32>
    %33 = vector.broadcast %7 : vector<1x8xf32> to vector<8x8xf32>
    %34 = arith.addf %32, %33 : vector<8x8xf32>
    %cst_17 = arith.constant dense<0xFF800000> : vector<8xf32>
    %35 = vector.multi_reduction <maximumf>, %34, %cst_17 [1] : vector<8x8xf32> to vector<8xf32>
    %36 = vector.shape_cast %35 : vector<8xf32> to vector<8x1xf32>
    %37 = vector.broadcast %36 : vector<8x1xf32> to vector<8x8xf32>
    %38 = arith.subf %34, %37 : vector<8x8xf32>
    %39 = math.exp %38 : vector<8x8xf32>
    %cst_18 = arith.constant dense<0.000000e+00> : vector<8xf32>
    %40 = vector.multi_reduction <add>, %39, %cst_18 [1] : vector<8x8xf32> to vector<8xf32>
    %41 = vector.shape_cast %40 : vector<8xf32> to vector<8x1xf32>
    %42 = arith.truncf %39 : vector<8x8xf32> to vector<8x8xbf16>
    %43 = vector.extract_strided_slice %5 {offsets = [0, 16], sizes = [8, 16], strides = [1, 1]} : vector<8x32xbf16> to vector<8x16xbf16>
    %cst_19 = arith.constant dense<0.000000e+00> : vector<8x16xf32>
    %44 = tpu.matmul %42, %43, %cst_19 {dimension_numbers = #tpu.dot_dimension_numbers<[1], [0], [0], [1], [0, 0, 1, 1], [], []>} : vector<8x8xbf16>, vector<8x16xbf16>, vector<8x16xf32> -> vector<8x16xf32>
    %45 = tpu.reciprocal %41 {approx = true} : vector<8x1xf32> -> vector<8x1xf32>
    %46 = vector.broadcast %45 : vector<8x1xf32> to vector<8x16xf32>
    %47 = arith.mulf %44, %46 : vector<8x16xf32>
    %48 = tpu.concatenate %27, %47 in 1 : vector<8x16xf32>, vector<8x16xf32> -> vector<8x32xf32>
    %49 = arith.truncf %48 : vector<8x32xf32> to vector<8x32xbf16>
    %c0_20 = arith.constant 0 : index
    %c0_21 = arith.constant 0 : index
    %c0_22 = arith.constant 0 : index
    %50 = vector.load %arg6[%c0_20, %c0_21, %c0_22] : memref<1x8x32xbf16, #tpu.memory_space<vmem>>, vector<1x8x32xbf16>
    %51 = vector.shape_cast %50 : vector<1x8x32xbf16> to vector<8x32xbf16>
    %52 = vector.shape_cast %49 : vector<8x32xbf16> to vector<1x8x32xbf16>
    tpu.vector_store %arg6[%c0_20, %c0_21, %c0_22], %52 {strides = array<i32>} : memref<1x8x32xbf16, #tpu.memory_space<vmem>>, vector<1x8x32xbf16>,
    return
  }
  func.func @transform_0(%arg0: i32, %arg1: i32) -> (i32, i32, i32) {
    %c0_i32 = arith.constant 0 : i32
    %c0_i32_0 = arith.constant 0 : i32
    return %arg0, %arg1, %c0_i32 : i32, i32, i32
  }
  func.func @transform_1(%arg0: i32, %arg1: i32) -> (i32, i32, i32) {
    %c0_i32 = arith.constant 0 : i32
    %c0_i32_0 = arith.constant 0 : i32
    %c0_i32_1 = arith.constant 0 : i32
    return %arg0, %c0_i32, %c0_i32_0 : i32, i32, i32
  }
  func.func @transform_2(%arg0: i32, %arg1: i32) -> (i32, i32, i32) {
    %c0_i32 = arith.constant 0 : i32
    %c0_i32_0 = arith.constant 0 : i32
    %c0_i32_1 = arith.constant 0 : i32
    return %arg0, %c0_i32, %c0_i32_0 : i32, i32, i32
  }
  func.func @transform_3(%arg0: i32, %arg1: i32) -> (i32, i32, i32) {
    %c0_i32 = arith.constant 0 : i32
    %c0_i32_0 = arith.constant 0 : i32
    %c0_i32_1 = arith.constant 0 : i32
    return %arg0, %c0_i32, %c0_i32_0 : i32, i32, i32
  }
  func.func @transform_4(%arg0: i32, %arg1: i32) -> (i32, i32, i32) {
    %c0_i32 = arith.constant 0 : i32
    %c0_i32_0 = arith.constant 0 : i32
    return %arg0, %arg1, %c0_i32 : i32, i32, i32
  }
}

module attributes {stable_mosaic.version = 11 : i64} {
  func.func @_qkv_kernel(%arg0: i32, %arg1: memref<16x32xbf16, #tpu.memory_space<vmem>>, %arg2: memref<32x32xbf16, #tpu.memory_space<vmem>>, %arg3: memref<32x32xbf16, #tpu.memory_space<vmem>>, %arg4: memref<32x32xbf16, #tpu.memory_space<vmem>>, %arg5: memref<1x32xf32, #tpu.memory_space<vmem>>, %arg6: memref<1x32xf32, #tpu.memory_space<vmem>>, %arg7: memref<1x32xf32, #tpu.memory_space<vmem>>, %arg8: memref<16x32xbf16, #tpu.memory_space<vmem>>, %arg9: memref<16x32xbf16, #tpu.memory_space<vmem>>, %arg10: memref<16x32xbf16, #tpu.memory_space<vmem>>) attributes {dimension_semantics = [#tpu.dimension_semantics<parallel>], iteration_bounds = array<i64: 1>, scalar_prefetch = 0 : i64, scratch_operands = 0 : i64, tpu.core_type = #tpu.core_type<tc>, window_params = [{transform_indices = @transform_0, window_bounds = array<i64: 16, 32>}, {pipeline_mode = #tpu.pipeline_mode<synchronous>, transform_indices = @transform_1, window_bounds = array<i64: 32, 32>}, {pipeline_mode = #tpu.pipeline_mode<synchronous>, transform_indices = @transform_2, window_bounds = array<i64: 32, 32>}, {pipeline_mode = #tpu.pipeline_mode<synchronous>, transform_indices = @transform_3, window_bounds = array<i64: 32, 32>}, {pipeline_mode = #tpu.pipeline_mode<synchronous>, transform_indices = @transform_4, window_bounds = array<i64: 1, 32>}, {pipeline_mode = #tpu.pipeline_mode<synchronous>, transform_indices = @transform_5, window_bounds = array<i64: 1, 32>}, {pipeline_mode = #tpu.pipeline_mode<synchronous>, transform_indices = @transform_6, window_bounds = array<i64: 1, 32>}, {transform_indices = @transform_7, window_bounds = array<i64: 16, 32>}, {transform_indices = @transform_8, window_bounds = array<i64: 16, 32>}, {transform_indices = @transform_9, window_bounds = array<i64: 16, 32>}]} {
    %c0 = arith.constant 0 : index
    %c0_0 = arith.constant 0 : index
    %0 = vector.load %arg1[%c0, %c0_0] : memref<16x32xbf16, #tpu.memory_space<vmem>>, vector<16x32xbf16>
    %c0_1 = arith.constant 0 : index
    %c0_2 = arith.constant 0 : index
    %1 = vector.load %arg2[%c0_1, %c0_2] : memref<32x32xbf16, #tpu.memory_space<vmem>>, vector<32x32xbf16>
    %cst = arith.constant dense<0.000000e+00> : vector<16x32xf32>
    %2 = tpu.matmul %0, %1, %cst {dimension_numbers = #tpu.dot_dimension_numbers<[1], [0], [0], [1], [0, 0, 1, 1], [], []>} : vector<16x32xbf16>, vector<32x32xbf16>, vector<16x32xf32> -> vector<16x32xf32>
    %c0_3 = arith.constant 0 : index
    %c0_4 = arith.constant 0 : index
    %3 = vector.load %arg5[%c0_3, %c0_4] : memref<1x32xf32, #tpu.memory_space<vmem>>, vector<1x32xf32>
    %4 = vector.broadcast %3 : vector<1x32xf32> to vector<16x32xf32>
    %5 = arith.addf %2, %4 : vector<16x32xf32>
    %6 = arith.truncf %5 : vector<16x32xf32> to vector<16x32xbf16>
    %c0_5 = arith.constant 0 : index
    %c0_6 = arith.constant 0 : index
    %7 = vector.load %arg8[%c0_5, %c0_6] : memref<16x32xbf16, #tpu.memory_space<vmem>>, vector<16x32xbf16>
    tpu.vector_store %arg8[%c0_5, %c0_6], %6 {strides = array<i32>} : memref<16x32xbf16, #tpu.memory_space<vmem>>, vector<16x32xbf16>,
    %c0_7 = arith.constant 0 : index
    %c0_8 = arith.constant 0 : index
    %8 = vector.load %arg3[%c0_7, %c0_8] : memref<32x32xbf16, #tpu.memory_space<vmem>>, vector<32x32xbf16>
    %cst_9 = arith.constant dense<0.000000e+00> : vector<16x32xf32>
    %9 = tpu.matmul %0, %8, %cst_9 {dimension_numbers = #tpu.dot_dimension_numbers<[1], [0], [0], [1], [0, 0, 1, 1], [], []>} : vector<16x32xbf16>, vector<32x32xbf16>, vector<16x32xf32> -> vector<16x32xf32>
    %c0_10 = arith.constant 0 : index
    %c0_11 = arith.constant 0 : index
    %10 = vector.load %arg6[%c0_10, %c0_11] : memref<1x32xf32, #tpu.memory_space<vmem>>, vector<1x32xf32>
    %11 = vector.broadcast %10 : vector<1x32xf32> to vector<16x32xf32>
    %12 = arith.addf %9, %11 : vector<16x32xf32>
    %13 = arith.truncf %12 : vector<16x32xf32> to vector<16x32xbf16>
    %c0_12 = arith.constant 0 : index
    %c0_13 = arith.constant 0 : index
    %14 = vector.load %arg9[%c0_12, %c0_13] : memref<16x32xbf16, #tpu.memory_space<vmem>>, vector<16x32xbf16>
    tpu.vector_store %arg9[%c0_12, %c0_13], %13 {strides = array<i32>} : memref<16x32xbf16, #tpu.memory_space<vmem>>, vector<16x32xbf16>,
    %c0_14 = arith.constant 0 : index
    %c0_15 = arith.constant 0 : index
    %15 = vector.load %arg4[%c0_14, %c0_15] : memref<32x32xbf16, #tpu.memory_space<vmem>>, vector<32x32xbf16>
    %cst_16 = arith.constant dense<0.000000e+00> : vector<16x32xf32>
    %16 = tpu.matmul %0, %15, %cst_16 {dimension_numbers = #tpu.dot_dimension_numbers<[1], [0], [0], [1], [0, 0, 1, 1], [], []>} : vector<16x32xbf16>, vector<32x32xbf16>, vector<16x32xf32> -> vector<16x32xf32>
    %c0_17 = arith.constant 0 : index
    %c0_18 = arith.constant 0 : index
    %17 = vector.load %arg7[%c0_17, %c0_18] : memref<1x32xf32, #tpu.memory_space<vmem>>, vector<1x32xf32>
    %18 = vector.broadcast %17 : vector<1x32xf32> to vector<16x32xf32>
    %19 = arith.addf %16, %18 : vector<16x32xf32>
    %20 = arith.truncf %19 : vector<16x32xf32> to vector<16x32xbf16>
    %c0_19 = arith.constant 0 : index
    %c0_20 = arith.constant 0 : index
    %21 = vector.load %arg10[%c0_19, %c0_20] : memref<16x32xbf16, #tpu.memory_space<vmem>>, vector<16x32xbf16>
    tpu.vector_store %arg10[%c0_19, %c0_20], %20 {strides = array<i32>} : memref<16x32xbf16, #tpu.memory_space<vmem>>, vector<16x32xbf16>,
    return
  }
  func.func @transform_0(%arg0: i32) -> (i32, i32) {
    %c0_i32 = arith.constant 0 : i32
    %c0_i32_0 = arith.constant 0 : i32
    return %arg0, %c0_i32 : i32, i32
  }
  func.func @transform_1(%arg0: i32) -> (i32, i32) {
    %c0_i32 = arith.constant 0 : i32
    %c0_i32_0 = arith.constant 0 : i32
    %c0_i32_1 = arith.constant 0 : i32
    return %c0_i32, %c0_i32_0 : i32, i32
  }
  func.func @transform_2(%arg0: i32) -> (i32, i32) {
    %c0_i32 = arith.constant 0 : i32
    %c0_i32_0 = arith.constant 0 : i32
    %c0_i32_1 = arith.constant 0 : i32
    return %c0_i32, %c0_i32_0 : i32, i32
  }
  func.func @transform_3(%arg0: i32) -> (i32, i32) {
    %c0_i32 = arith.constant 0 : i32
    %c0_i32_0 = arith.constant 0 : i32
    %c0_i32_1 = arith.constant 0 : i32
    return %c0_i32, %c0_i32_0 : i32, i32
  }
  func.func @transform_4(%arg0: i32) -> (i32, i32) {
    %c0_i32 = arith.constant 0 : i32
    %c0_i32_0 = arith.constant 0 : i32
    %c0_i32_1 = arith.constant 0 : i32
    return %c0_i32, %c0_i32_0 : i32, i32
  }
  func.func @transform_5(%arg0: i32) -> (i32, i32) {
    %c0_i32 = arith.constant 0 : i32
    %c0_i32_0 = arith.constant 0 : i32
    %c0_i32_1 = arith.constant 0 : i32
    return %c0_i32, %c0_i32_0 : i32, i32
  }
  func.func @transform_6(%arg0: i32) -> (i32, i32) {
    %c0_i32 = arith.constant 0 : i32
    %c0_i32_0 = arith.constant 0 : i32
    %c0_i32_1 = arith.constant 0 : i32
    return %c0_i32, %c0_i32_0 : i32, i32
  }
  func.func @transform_7(%arg0: i32) -> (i32, i32) {
    %c0_i32 = arith.constant 0 : i32
    %c0_i32_0 = arith.constant 0 : i32
    return %arg0, %c0_i32 : i32, i32
  }
  func.func @transform_8(%arg0: i32) -> (i32, i32) {
    %c0_i32 = arith.constant 0 : i32
    %c0_i32_0 = arith.constant 0 : i32
    return %arg0, %c0_i32 : i32, i32
  }
  func.func @transform_9(%arg0: i32) -> (i32, i32) {
    %c0_i32 = arith.constant 0 : i32
    %c0_i32_0 = arith.constant 0 : i32
    return %arg0, %c0_i32 : i32, i32
  }
}

module attributes {stable_mosaic.version = 11 : i64} {
  func.func @_linear_add_ln_kernel(%arg0: i32, %arg1: memref<16x32xbf16, #tpu.memory_space<vmem>>, %arg2: memref<32x32xbf16, #tpu.memory_space<vmem>>, %arg3: memref<1x32xf32, #tpu.memory_space<vmem>>, %arg4: memref<16x32xbf16, #tpu.memory_space<vmem>>, %arg5: memref<1x32xf32, #tpu.memory_space<vmem>>, %arg6: memref<1x32xf32, #tpu.memory_space<vmem>>, %arg7: memref<16x32xbf16, #tpu.memory_space<vmem>>) attributes {dimension_semantics = [#tpu.dimension_semantics<parallel>], iteration_bounds = array<i64: 1>, scalar_prefetch = 0 : i64, scratch_operands = 0 : i64, tpu.core_type = #tpu.core_type<tc>, window_params = [{transform_indices = @transform_0, window_bounds = array<i64: 16, 32>}, {pipeline_mode = #tpu.pipeline_mode<synchronous>, transform_indices = @transform_1, window_bounds = array<i64: 32, 32>}, {pipeline_mode = #tpu.pipeline_mode<synchronous>, transform_indices = @transform_2, window_bounds = array<i64: 1, 32>}, {transform_indices = @transform_3, window_bounds = array<i64: 16, 32>}, {pipeline_mode = #tpu.pipeline_mode<synchronous>, transform_indices = @transform_4, window_bounds = array<i64: 1, 32>}, {pipeline_mode = #tpu.pipeline_mode<synchronous>, transform_indices = @transform_5, window_bounds = array<i64: 1, 32>}, {transform_indices = @transform_6, window_bounds = array<i64: 16, 32>}]} {
    %c0 = arith.constant 0 : index
    %c0_0 = arith.constant 0 : index
    %0 = vector.load %arg1[%c0, %c0_0] : memref<16x32xbf16, #tpu.memory_space<vmem>>, vector<16x32xbf16>
    %c0_1 = arith.constant 0 : index
    %c0_2 = arith.constant 0 : index
    %1 = vector.load %arg2[%c0_1, %c0_2] : memref<32x32xbf16, #tpu.memory_space<vmem>>, vector<32x32xbf16>
    %cst = arith.constant dense<0.000000e+00> : vector<16x32xf32>
    %2 = tpu.matmul %0, %1, %cst {dimension_numbers = #tpu.dot_dimension_numbers<[1], [0], [0], [1], [0, 0, 1, 1], [], []>} : vector<16x32xbf16>, vector<32x32xbf16>, vector<16x32xf32> -> vector<16x32xf32>
    %c0_3 = arith.constant 0 : index
    %c0_4 = arith.constant 0 : index
    %3 = vector.load %arg3[%c0_3, %c0_4] : memref<1x32xf32, #tpu.memory_space<vmem>>, vector<1x32xf32>
    %4 = vector.broadcast %3 : vector<1x32xf32> to vector<16x32xf32>
    %5 = arith.addf %2, %4 : vector<16x32xf32>
    %c0_5 = arith.constant 0 : index
    %c0_6 = arith.constant 0 : index
    %6 = vector.load %arg4[%c0_5, %c0_6] : memref<16x32xbf16, #tpu.memory_space<vmem>>, vector<16x32xbf16>
    %7 = arith.extf %6 : vector<16x32xbf16> to vector<16x32xf32>
    %8 = arith.addf %5, %7 : vector<16x32xf32>
    %cst_7 = arith.constant dense<0.000000e+00> : vector<16xf32>
    %9 = vector.multi_reduction <add>, %8, %cst_7 [1] : vector<16x32xf32> to vector<16xf32>
    %10 = vector.shape_cast %9 : vector<16xf32> to vector<16x1xf32>
    %cst_8 = arith.constant 3.200000e+01 : f32
    %11 = vector.broadcast %cst_8 : f32 to vector<16x1xf32>
    %12 = arith.divf %10, %11 : vector<16x1xf32>
    %13 = vector.broadcast %12 : vector<16x1xf32> to vector<16x32xf32>
    %14 = arith.subf %8, %13 : vector<16x32xf32>
    %15 = arith.mulf %14, %14 : vector<16x32xf32>
    %cst_9 = arith.constant dense<0.000000e+00> : vector<16xf32>
    %16 = vector.multi_reduction <add>, %15, %cst_9 [1] : vector<16x32xf32> to vector<16xf32>
    %17 = vector.shape_cast %16 : vector<16xf32> to vector<16x1xf32>
    %cst_10 = arith.constant 3.200000e+01 : f32
    %18 = vector.broadcast %cst_10 : f32 to vector<16x1xf32>
    %19 = arith.divf %17, %18 : vector<16x1xf32>
    %20 = vector.broadcast %12 : vector<16x1xf32> to vector<16x32xf32>
    %21 = arith.subf %8, %20 : vector<16x32xf32>
    %cst_11 = arith.constant 9.99999996E-13 : f32
    %22 = vector.broadcast %cst_11 : f32 to vector<16x1xf32>
    %23 = arith.addf %19, %22 : vector<16x1xf32>
    %24 = math.rsqrt %23 : vector<16x1xf32>
    %25 = vector.broadcast %24 : vector<16x1xf32> to vector<16x32xf32>
    %26 = arith.mulf %21, %25 : vector<16x32xf32>
    %c0_12 = arith.constant 0 : index
    %c0_13 = arith.constant 0 : index
    %27 = vector.load %arg5[%c0_12, %c0_13] : memref<1x32xf32, #tpu.memory_space<vmem>>, vector<1x32xf32>
    %28 = vector.broadcast %27 : vector<1x32xf32> to vector<16x32xf32>
    %29 = arith.mulf %26, %28 : vector<16x32xf32>
    %c0_14 = arith.constant 0 : index
    %c0_15 = arith.constant 0 : index
    %30 = vector.load %arg6[%c0_14, %c0_15] : memref<1x32xf32, #tpu.memory_space<vmem>>, vector<1x32xf32>
    %31 = vector.broadcast %30 : vector<1x32xf32> to vector<16x32xf32>
    %32 = arith.addf %29, %31 : vector<16x32xf32>
    %33 = arith.truncf %32 : vector<16x32xf32> to vector<16x32xbf16>
    %c0_16 = arith.constant 0 : index
    %c0_17 = arith.constant 0 : index
    %34 = vector.load %arg7[%c0_16, %c0_17] : memref<16x32xbf16, #tpu.memory_space<vmem>>, vector<16x32xbf16>
    tpu.vector_store %arg7[%c0_16, %c0_17], %33 {strides = array<i32>} : memref<16x32xbf16, #tpu.memory_space<vmem>>, vector<16x32xbf16>,
    return
  }
  func.func @transform_0(%arg0: i32) -> (i32, i32) {
    %c0_i32 = arith.constant 0 : i32
    %c0_i32_0 = arith.constant 0 : i32
    return %arg0, %c0_i32 : i32, i32
  }
  func.func @transform_1(%arg0: i32) -> (i32, i32) {
    %c0_i32 = arith.constant 0 : i32
    %c0_i32_0 = arith.constant 0 : i32
    %c0_i32_1 = arith.constant 0 : i32
    return %c0_i32, %c0_i32_0 : i32, i32
  }
  func.func @transform_2(%arg0: i32) -> (i32, i32) {
    %c0_i32 = arith.constant 0 : i32
    %c0_i32_0 = arith.constant 0 : i32
    %c0_i32_1 = arith.constant 0 : i32
    return %c0_i32, %c0_i32_0 : i32, i32
  }
  func.func @transform_3(%arg0: i32) -> (i32, i32) {
    %c0_i32 = arith.constant 0 : i32
    %c0_i32_0 = arith.constant 0 : i32
    return %arg0, %c0_i32 : i32, i32
  }
  func.func @transform_4(%arg0: i32) -> (i32, i32) {
    %c0_i32 = arith.constant 0 : i32
    %c0_i32_0 = arith.constant 0 : i32
    %c0_i32_1 = arith.constant 0 : i32
    return %c0_i32, %c0_i32_0 : i32, i32
  }
  func.func @transform_5(%arg0: i32) -> (i32, i32) {
    %c0_i32 = arith.constant 0 : i32
    %c0_i32_0 = arith.constant 0 : i32
    %c0_i32_1 = arith.constant 0 : i32
    return %c0_i32, %c0_i32_0 : i32, i32
  }
  func.func @transform_6(%arg0: i32) -> (i32, i32) {
    %c0_i32 = arith.constant 0 : i32
    %c0_i32_0 = arith.constant 0 : i32
    return %arg0, %c0_i32 : i32, i32
  }
}

module attributes {stable_mosaic.version = 11 : i64} {
  func.func @_linear_kernel(%arg0: i32, %arg1: i32, %arg2: memref<16x32xbf16, #tpu.memory_space<vmem>>, %arg3: memref<32x64xbf16, #tpu.memory_space<vmem>>, %arg4: memref<1x64xf32, #tpu.memory_space<vmem>>, %arg5: memref<16x64xbf16, #tpu.memory_space<vmem>>) attributes {dimension_semantics = [#tpu.dimension_semantics<parallel>, #tpu.dimension_semantics<parallel>], iteration_bounds = array<i64: 1, 1>, scalar_prefetch = 0 : i64, scratch_operands = 0 : i64, tpu.core_type = #tpu.core_type<tc>, window_params = [{transform_indices = @transform_0, window_bounds = array<i64: 16, 32>}, {transform_indices = @transform_1, window_bounds = array<i64: 32, 64>}, {transform_indices = @transform_2, window_bounds = array<i64: 1, 64>}, {transform_indices = @transform_3, window_bounds = array<i64: 16, 64>}]} {
    %c0 = arith.constant 0 : index
    %c0_0 = arith.constant 0 : index
    %0 = vector.load %arg2[%c0, %c0_0] : memref<16x32xbf16, #tpu.memory_space<vmem>>, vector<16x32xbf16>
    %c0_1 = arith.constant 0 : index
    %c0_2 = arith.constant 0 : index
    %1 = vector.load %arg3[%c0_1, %c0_2] : memref<32x64xbf16, #tpu.memory_space<vmem>>, vector<32x64xbf16>
    %cst = arith.constant dense<0.000000e+00> : vector<16x64xf32>
    %2 = tpu.matmul %0, %1, %cst {dimension_numbers = #tpu.dot_dimension_numbers<[1], [0], [0], [1], [0, 0, 1, 1], [], []>} : vector<16x32xbf16>, vector<32x64xbf16>, vector<16x64xf32> -> vector<16x64xf32>
    %c0_3 = arith.constant 0 : index
    %c0_4 = arith.constant 0 : index
    %3 = vector.load %arg4[%c0_3, %c0_4] : memref<1x64xf32, #tpu.memory_space<vmem>>, vector<1x64xf32>
    %4 = vector.broadcast %3 : vector<1x64xf32> to vector<16x64xf32>
    %5 = arith.addf %2, %4 : vector<16x64xf32>
    %cst_5 = arith.constant 5.000000e-01 : f32
    %6 = vector.broadcast %cst_5 : f32 to vector<16x64xf32>
    %7 = arith.mulf %6, %5 : vector<16x64xf32>
    %cst_6 = arith.constant 4.471500e-02 : f32
    %8 = vector.broadcast %cst_6 : f32 to vector<16x64xf32>
    %9 = arith.mulf %8, %5 : vector<16x64xf32>
    %10 = arith.mulf %9, %5 : vector<16x64xf32>
    %11 = arith.mulf %10, %5 : vector<16x64xf32>
    %12 = arith.addf %5, %11 : vector<16x64xf32>
    %cst_7 = arith.constant 0.797884583 : f32
    %13 = vector.broadcast %cst_7 : f32 to vector<16x64xf32>
    %14 = arith.mulf %13, %12 : vector<16x64xf32>
    %15 = math.tanh %14 : vector<16x64xf32>
    %cst_8 = arith.constant 1.000000e+00 : f32
    %16 = vector.broadcast %cst_8 : f32 to vector<16x64xf32>
    %17 = arith.addf %16, %15 : vector<16x64xf32>
    %18 = arith.mulf %7, %17 : vector<16x64xf32>
    %19 = arith.truncf %18 : vector<16x64xf32> to vector<16x64xbf16>
    %c0_9 = arith.constant 0 : index
    %c0_10 = arith.constant 0 : index
    %20 = vector.load %arg5[%c0_9, %c0_10] : memref<16x64xbf16, #tpu.memory_space<vmem>>, vector<16x64xbf16>
    tpu.vector_store %arg5[%c0_9, %c0_10], %19 {strides = array<i32>} : memref<16x64xbf16, #tpu.memory_space<vmem>>, vector<16x64xbf16>,
    return
  }
  func.func @transform_0(%arg0: i32, %arg1: i32) -> (i32, i32) {
    %c0_i32 = arith.constant 0 : i32
    %c0_i32_0 = arith.constant 0 : i32
    return %arg0, %c0_i32 : i32, i32
  }
  func.func @transform_1(%arg0: i32, %arg1: i32) -> (i32, i32) {
    %c0_i32 = arith.constant 0 : i32
    %c0_i32_0 = arith.constant 0 : i32
    return %c0_i32, %arg1 : i32, i32
  }
  func.func @transform_2(%arg0: i32, %arg1: i32) -> (i32, i32) {
    %c0_i32 = arith.constant 0 : i32
    %c0_i32_0 = arith.constant 0 : i32
    return %c0_i32, %arg1 : i32, i32
  }
  func.func @transform_3(%arg0: i32, %arg1: i32) -> (i32, i32) {
    %c0_i32 = arith.constant 0 : i32
    return %arg0, %arg1 : i32, i32
  }
}

module attributes {stable_mosaic.version = 11 : i64} {
  func.func @_linear_add_ln_kernel(%arg0: i32, %arg1: memref<16x64xbf16, #tpu.memory_space<vmem>>, %arg2: memref<64x32xbf16, #tpu.memory_space<vmem>>, %arg3: memref<1x32xf32, #tpu.memory_space<vmem>>, %arg4: memref<16x32xbf16, #tpu.memory_space<vmem>>, %arg5: memref<1x32xf32, #tpu.memory_space<vmem>>, %arg6: memref<1x32xf32, #tpu.memory_space<vmem>>, %arg7: memref<16x32xbf16, #tpu.memory_space<vmem>>) attributes {dimension_semantics = [#tpu.dimension_semantics<parallel>], iteration_bounds = array<i64: 1>, scalar_prefetch = 0 : i64, scratch_operands = 0 : i64, tpu.core_type = #tpu.core_type<tc>, window_params = [{transform_indices = @transform_0, window_bounds = array<i64: 16, 64>}, {pipeline_mode = #tpu.pipeline_mode<synchronous>, transform_indices = @transform_1, window_bounds = array<i64: 64, 32>}, {pipeline_mode = #tpu.pipeline_mode<synchronous>, transform_indices = @transform_2, window_bounds = array<i64: 1, 32>}, {transform_indices = @transform_3, window_bounds = array<i64: 16, 32>}, {pipeline_mode = #tpu.pipeline_mode<synchronous>, transform_indices = @transform_4, window_bounds = array<i64: 1, 32>}, {pipeline_mode = #tpu.pipeline_mode<synchronous>, transform_indices = @transform_5, window_bounds = array<i64: 1, 32>}, {transform_indices = @transform_6, window_bounds = array<i64: 16, 32>}]} {
    %c0 = arith.constant 0 : index
    %c0_0 = arith.constant 0 : index
    %0 = vector.load %arg1[%c0, %c0_0] : memref<16x64xbf16, #tpu.memory_space<vmem>>, vector<16x64xbf16>
    %c0_1 = arith.constant 0 : index
    %c0_2 = arith.constant 0 : index
    %1 = vector.load %arg2[%c0_1, %c0_2] : memref<64x32xbf16, #tpu.memory_space<vmem>>, vector<64x32xbf16>
    %cst = arith.constant dense<0.000000e+00> : vector<16x32xf32>
    %2 = tpu.matmul %0, %1, %cst {dimension_numbers = #tpu.dot_dimension_numbers<[1], [0], [0], [1], [0, 0, 1, 1], [], []>} : vector<16x64xbf16>, vector<64x32xbf16>, vector<16x32xf32> -> vector<16x32xf32>
    %c0_3 = arith.constant 0 : index
    %c0_4 = arith.constant 0 : index
    %3 = vector.load %arg3[%c0_3, %c0_4] : memref<1x32xf32, #tpu.memory_space<vmem>>, vector<1x32xf32>
    %4 = vector.broadcast %3 : vector<1x32xf32> to vector<16x32xf32>
    %5 = arith.addf %2, %4 : vector<16x32xf32>
    %c0_5 = arith.constant 0 : index
    %c0_6 = arith.constant 0 : index
    %6 = vector.load %arg4[%c0_5, %c0_6] : memref<16x32xbf16, #tpu.memory_space<vmem>>, vector<16x32xbf16>
    %7 = arith.extf %6 : vector<16x32xbf16> to vector<16x32xf32>
    %8 = arith.addf %5, %7 : vector<16x32xf32>
    %cst_7 = arith.constant dense<0.000000e+00> : vector<16xf32>
    %9 = vector.multi_reduction <add>, %8, %cst_7 [1] : vector<16x32xf32> to vector<16xf32>
    %10 = vector.shape_cast %9 : vector<16xf32> to vector<16x1xf32>
    %cst_8 = arith.constant 3.200000e+01 : f32
    %11 = vector.broadcast %cst_8 : f32 to vector<16x1xf32>
    %12 = arith.divf %10, %11 : vector<16x1xf32>
    %13 = vector.broadcast %12 : vector<16x1xf32> to vector<16x32xf32>
    %14 = arith.subf %8, %13 : vector<16x32xf32>
    %15 = arith.mulf %14, %14 : vector<16x32xf32>
    %cst_9 = arith.constant dense<0.000000e+00> : vector<16xf32>
    %16 = vector.multi_reduction <add>, %15, %cst_9 [1] : vector<16x32xf32> to vector<16xf32>
    %17 = vector.shape_cast %16 : vector<16xf32> to vector<16x1xf32>
    %cst_10 = arith.constant 3.200000e+01 : f32
    %18 = vector.broadcast %cst_10 : f32 to vector<16x1xf32>
    %19 = arith.divf %17, %18 : vector<16x1xf32>
    %20 = vector.broadcast %12 : vector<16x1xf32> to vector<16x32xf32>
    %21 = arith.subf %8, %20 : vector<16x32xf32>
    %cst_11 = arith.constant 9.99999996E-13 : f32
    %22 = vector.broadcast %cst_11 : f32 to vector<16x1xf32>
    %23 = arith.addf %19, %22 : vector<16x1xf32>
    %24 = math.rsqrt %23 : vector<16x1xf32>
    %25 = vector.broadcast %24 : vector<16x1xf32> to vector<16x32xf32>
    %26 = arith.mulf %21, %25 : vector<16x32xf32>
    %c0_12 = arith.constant 0 : index
    %c0_13 = arith.constant 0 : index
    %27 = vector.load %arg5[%c0_12, %c0_13] : memref<1x32xf32, #tpu.memory_space<vmem>>, vector<1x32xf32>
    %28 = vector.broadcast %27 : vector<1x32xf32> to vector<16x32xf32>
    %29 = arith.mulf %26, %28 : vector<16x32xf32>
    %c0_14 = arith.constant 0 : index
    %c0_15 = arith.constant 0 : index
    %30 = vector.load %arg6[%c0_14, %c0_15] : memref<1x32xf32, #tpu.memory_space<vmem>>, vector<1x32xf32>
    %31 = vector.broadcast %30 : vector<1x32xf32> to vector<16x32xf32>
    %32 = arith.addf %29, %31 : vector<16x32xf32>
    %33 = arith.truncf %32 : vector<16x32xf32> to vector<16x32xbf16>
    %c0_16 = arith.constant 0 : index
    %c0_17 = arith.constant 0 : index
    %34 = vector.load %arg7[%c0_16, %c0_17] : memref<16x32xbf16, #tpu.memory_space<vmem>>, vector<16x32xbf16>
    tpu.vector_store %arg7[%c0_16, %c0_17], %33 {strides = array<i32>} : memref<16x32xbf16, #tpu.memory_space<vmem>>, vector<16x32xbf16>,
    return
  }
  func.func @transform_0(%arg0: i32) -> (i32, i32) {
    %c0_i32 = arith.constant 0 : i32
    %c0_i32_0 = arith.constant 0 : i32
    return %arg0, %c0_i32 : i32, i32
  }
  func.func @transform_1(%arg0: i32) -> (i32, i32) {
    %c0_i32 = arith.constant 0 : i32
    %c0_i32_0 = arith.constant 0 : i32
    %c0_i32_1 = arith.constant 0 : i32
    return %c0_i32, %c0_i32_0 : i32, i32
  }
  func.func @transform_2(%arg0: i32) -> (i32, i32) {
    %c0_i32 = arith.constant 0 : i32
    %c0_i32_0 = arith.constant 0 : i32
    %c0_i32_1 = arith.constant 0 : i32
    return %c0_i32, %c0_i32_0 : i32, i32
  }
  func.func @transform_3(%arg0: i32) -> (i32, i32) {
    %c0_i32 = arith.constant 0 : i32
    %c0_i32_0 = arith.constant 0 : i32
    return %arg0, %c0_i32 : i32, i32
  }
  func.func @transform_4(%arg0: i32) -> (i32, i32) {
    %c0_i32 = arith.constant 0 : i32
    %c0_i32_0 = arith.constant 0 : i32
    %c0_i32_1 = arith.constant 0 : i32
    return %c0_i32, %c0_i32_0 : i32, i32
  }
  func.func @transform_5(%arg0: i32) -> (i32, i32) {
    %c0_i32 = arith.constant 0 : i32
    %c0_i32_0 = arith.constant 0 : i32
    %c0_i32_1 = arith.constant 0 : i32
    return %c0_i32, %c0_i32_0 : i32, i32
  }
  func.func @transform_6(%arg0: i32) -> (i32, i32) {
    %c0_i32 = arith.constant 0 : i32
    %c0_i32_0 = arith.constant 0 : i32
    return %arg0, %c0_i32 : i32, i32
  }
}

module attributes {stable_mosaic.version = 11 : i64} {
  func.func @_linear_kernel(%arg0: i32, %arg1: i32, %arg2: memref<2x32xbf16, #tpu.memory_space<vmem>>, %arg3: memref<32x3xbf16, #tpu.memory_space<vmem>>, %arg4: memref<1x3xf32, #tpu.memory_space<vmem>>, %arg5: memref<2x3xf32, #tpu.memory_space<vmem>>) attributes {dimension_semantics = [#tpu.dimension_semantics<parallel>, #tpu.dimension_semantics<parallel>], iteration_bounds = array<i64: 1, 1>, scalar_prefetch = 0 : i64, scratch_operands = 0 : i64, tpu.core_type = #tpu.core_type<tc>, window_params = [{transform_indices = @transform_0, window_bounds = array<i64: 2, 32>}, {transform_indices = @transform_1, window_bounds = array<i64: 32, 3>}, {transform_indices = @transform_2, window_bounds = array<i64: 1, 3>}, {transform_indices = @transform_3, window_bounds = array<i64: 2, 3>}]} {
    %c0 = arith.constant 0 : index
    %c0_0 = arith.constant 0 : index
    %0 = vector.load %arg2[%c0, %c0_0] : memref<2x32xbf16, #tpu.memory_space<vmem>>, vector<2x32xbf16>
    %c0_1 = arith.constant 0 : index
    %c0_2 = arith.constant 0 : index
    %1 = vector.load %arg3[%c0_1, %c0_2] : memref<32x3xbf16, #tpu.memory_space<vmem>>, vector<32x3xbf16>
    %cst = arith.constant dense<0.000000e+00> : vector<2x3xf32>
    %2 = tpu.matmul %0, %1, %cst {dimension_numbers = #tpu.dot_dimension_numbers<[1], [0], [0], [1], [0, 0, 1, 1], [], []>} : vector<2x32xbf16>, vector<32x3xbf16>, vector<2x3xf32> -> vector<2x3xf32>
    %c0_3 = arith.constant 0 : index
    %c0_4 = arith.constant 0 : index
    %3 = vector.load %arg4[%c0_3, %c0_4] : memref<1x3xf32, #tpu.memory_space<vmem>>, vector<1x3xf32>
    %4 = vector.broadcast %3 : vector<1x3xf32> to vector<2x3xf32>
    %5 = arith.addf %2, %4 : vector<2x3xf32>
    %c0_5 = arith.constant 0 : index
    %c0_6 = arith.constant 0 : index
    %6 = vector.load %arg5[%c0_5, %c0_6] : memref<2x3xf32, #tpu.memory_space<vmem>>, vector<2x3xf32>
    tpu.vector_store %arg5[%c0_5, %c0_6], %5 {strides = array<i32>} : memref<2x3xf32, #tpu.memory_space<vmem>>, vector<2x3xf32>,
    return
  }
  func.func @transform_0(%arg0: i32, %arg1: i32) -> (i32, i32) {
    %c0_i32 = arith.constant 0 : i32
    %c0_i32_0 = arith.constant 0 : i32
    return %arg0, %c0_i32 : i32, i32
  }
  func.func @transform_1(%arg0: i32, %arg1: i32) -> (i32, i32) {
    %c0_i32 = arith.constant 0 : i32
    %c0_i32_0 = arith.constant 0 : i32
    return %c0_i32, %arg1 : i32, i32
  }
  func.func @transform_2(%arg0: i32, %arg1: i32) -> (i32, i32) {
    %c0_i32 = arith.constant 0 : i32
    %c0_i32_0 = arith.constant 0 : i32
    return %c0_i32, %arg1 : i32, i32
  }
  func.func @transform_3(%arg0: i32, %arg1: i32) -> (i32, i32) {
    %c0_i32 = arith.constant 0 : i32
    return %arg0, %arg1 : i32, i32
  }
}

module attributes {stable_mosaic.version = 11 : i64} {
  func.func @_linear_kernel(%arg0: i32, %arg1: i32, %arg2: memref<2x32xbf16, #tpu.memory_space<vmem>>, %arg3: memref<32x32xbf16, #tpu.memory_space<vmem>>, %arg4: memref<1x32xf32, #tpu.memory_space<vmem>>, %arg5: memref<2x32xbf16, #tpu.memory_space<vmem>>) attributes {dimension_semantics = [#tpu.dimension_semantics<parallel>, #tpu.dimension_semantics<parallel>], iteration_bounds = array<i64: 1, 1>, scalar_prefetch = 0 : i64, scratch_operands = 0 : i64, tpu.core_type = #tpu.core_type<tc>, window_params = [{transform_indices = @transform_0, window_bounds = array<i64: 2, 32>}, {transform_indices = @transform_1, window_bounds = array<i64: 32, 32>}, {transform_indices = @transform_2, window_bounds = array<i64: 1, 32>}, {transform_indices = @transform_3, window_bounds = array<i64: 2, 32>}]} {
    %c0 = arith.constant 0 : index
    %c0_0 = arith.constant 0 : index
    %0 = vector.load %arg2[%c0, %c0_0] : memref<2x32xbf16, #tpu.memory_space<vmem>>, vector<2x32xbf16>
    %c0_1 = arith.constant 0 : index
    %c0_2 = arith.constant 0 : index
    %1 = vector.load %arg3[%c0_1, %c0_2] : memref<32x32xbf16, #tpu.memory_space<vmem>>, vector<32x32xbf16>
    %cst = arith.constant dense<0.000000e+00> : vector<2x32xf32>
    %2 = tpu.matmul %0, %1, %cst {dimension_numbers = #tpu.dot_dimension_numbers<[1], [0], [0], [1], [0, 0, 1, 1], [], []>} : vector<2x32xbf16>, vector<32x32xbf16>, vector<2x32xf32> -> vector<2x32xf32>
    %c0_3 = arith.constant 0 : index
    %c0_4 = arith.constant 0 : index
    %3 = vector.load %arg4[%c0_3, %c0_4] : memref<1x32xf32, #tpu.memory_space<vmem>>, vector<1x32xf32>
    %4 = vector.broadcast %3 : vector<1x32xf32> to vector<2x32xf32>
    %5 = arith.addf %2, %4 : vector<2x32xf32>
    %cst_5 = arith.constant 0.000000e+00 : f32
    %6 = vector.broadcast %cst_5 : f32 to vector<2x32xf32>
    %7 = arith.maximumf %5, %6 : vector<2x32xf32>
    %8 = arith.truncf %7 : vector<2x32xf32> to vector<2x32xbf16>
    %c0_6 = arith.constant 0 : index
    %c0_7 = arith.constant 0 : index
    %9 = vector.load %arg5[%c0_6, %c0_7] : memref<2x32xbf16, #tpu.memory_space<vmem>>, vector<2x32xbf16>
    tpu.vector_store %arg5[%c0_6, %c0_7], %8 {strides = array<i32>} : memref<2x32xbf16, #tpu.memory_space<vmem>>, vector<2x32xbf16>,
    return
  }
  func.func @transform_0(%arg0: i32, %arg1: i32) -> (i32, i32) {
    %c0_i32 = arith.constant 0 : i32
    %c0_i32_0 = arith.constant 0 : i32
    return %arg0, %c0_i32 : i32, i32
  }
  func.func @transform_1(%arg0: i32, %arg1: i32) -> (i32, i32) {
    %c0_i32 = arith.constant 0 : i32
    %c0_i32_0 = arith.constant 0 : i32
    return %c0_i32, %arg1 : i32, i32
  }
  func.func @transform_2(%arg0: i32, %arg1: i32) -> (i32, i32) {
    %c0_i32 = arith.constant 0 : i32
    %c0_i32_0 = arith.constant 0 : i32
    return %c0_i32, %arg1 : i32, i32
  }
  func.func @transform_3(%arg0: i32, %arg1: i32) -> (i32, i32) {
    %c0_i32 = arith.constant 0 : i32
    return %arg0, %arg1 : i32, i32
  }
}

</mosaic_0001>

<bundles_post_ra>
// kernel: distilbert_classifier_forward.13
= control target key start
LH: loop header
LB: loop body
LE: loop exit
PB: predicated region body
PF: predicated region fallthrough
CT: control target
= control target key end

     0   :  { %vm16_vm0 = vcmask 261120   ;;  %vm70_vm1 = vcmask 257024   ;;  %s129_s0 = inlined_call_operand.vmem [shape: f32[16,32], index: 0, kind: input, shape index: {}]   ;;  %s130_s1 = inlined_call_operand.vmem [shape: f32[1,32], index: 1, kind: input, shape index: {}]   ;;  %s131_s2 = inlined_call_operand.vmem [shape: f32[1,32], index: 2, kind: input, shape index: {}]   ;;  %s132_s3 = inlined_call_operand.vmem [shape: bf16[16,32], index: 3, kind: output, shape index: {}]  }
   0x1   :  { %v14_v0 = vld [vmem:[%s129_s0] sm:$0xff]  ;;  %v15_v1 = vld [vmem:[%s129_s0 + $0x8] sm:$0xff] }
   0x2   :  { %v17_v2 = vsel %vm16_vm0, %v14_v0, 0.0  ;;  %v20_v3 = vsel %vm16_vm0, %v15_v1, 0.0  ;;  %v77_v21 = vld [vmem:[%s130_s1] ss:$0 sm:$0xff] }
   0x3   :  { %18 = vadd.xlane.f32.xlu0 %v17_v2  ;;  %v78_v23 = vld [vmem:[%s131_s2] ss:$0 sm:$0xff] }
   0x7   :  { %21 = vadd.xlane.f32.xlu0 %v20_v3 }
  0x8c   :  { %v19_v4 = vpop.xlane.xlu0 %18 }
  0x8d   :  { %v24_v5 = vmul.f32 0.03125, %v19_v4 }
  0x8f   :  { %v26_v6 = vsub.f32 %v14_v0, %v24_v5 }
  0x90   :  { %v22_v7 = vpop.xlane.xlu0 %21 }
  0x91   :  { %v25_v8 = vmul.f32 0.03125, %v22_v7  ;;  %v28_v9 = vmul.f32 %v26_v6, %v26_v6 }
  0x93   :  { %v27_v10 = vsub.f32 %v15_v1, %v25_v8  ;;  %v30_v11 = vsel %vm16_vm0, %v28_v9, 0.0 }
  0x94   :  { %31 = vadd.xlane.f32.xlu1 %v30_v11 }
  0x95   :  { %v29_v12 = vmul.f32 %v27_v10, %v27_v10 }
  0x97   :  { %v33_v13 = vsel %vm16_vm0, %v29_v12, 0.0 }
  0x98   :  { %34 = vadd.xlane.f32.xlu1 %v33_v13 }
 0x11d   :  { %v32_v14 = vpop.xlane.xlu1 %31 }
 0x11e   :  { %v36_v15 = vmul.f32 0.03125, %v32_v14 }
 0x120   :  { %v38_v16 = vadd.f32 1e-12, %v36_v15 }
 0x121   :  { %v35_v17 = vpop.xlane.xlu1 %34 }
 0x122   :  { %83 = vrsqrt.f32 %v38_v16  ;;  %v37_v18 = vmul.f32 0.03125, %v35_v17 }
 0x124   :  { %v39_v19 = vadd.f32 1e-12, %v37_v18 }
 0x126   :  { %85 = vrsqrt.f32 %v39_v19 }
 0x12f   :  { %v84_v20 = vpop.eup %83 }
 0x130   :  { %v42_v22 = vmul.f32 %v84_v20, %v26_v6 }
 0x132   :  { %v51_v24 = vmul.f32 %v77_v21, %v42_v22 }
 0x133   :  { %v86_v25 = vpop.eup %85 }
 0x134   :  { %v60_v26 = vadd.f32 %v78_v23, %v51_v24  ;;  %v43_v27 = vmul.f32 %v86_v25, %v27_v10 }
 0x136   :  { %v81_v28 = vpack.c.bf16 %v60_v26, %v60_v26  ;;  %v52_v29 = vmul.f32 %v77_v21, %v43_v27 }
 0x138   :  { %71 = vst.msk [vmem:[%s132_s3] sm:$0xf] %vm70_vm1, %v81_v28  ;;  %v61_v30 = vadd.f32 %v78_v23, %v52_v29 }
 0x13a   :  { %v82_v31 = vpack.c.bf16 %v61_v30, %v61_v30 }
 0x13c   :  { %72 = vst.msk [vmem:[%s132_s3 + $0x4] sm:$0xf] %vm70_vm1, %v82_v31 }

// kernel: distilbert_classifier_forward.16
= control target key start
LH: loop header
LB: loop body
LE: loop exit
PB: predicated region body
PF: predicated region fallthrough
CT: control target
= control target key end

     0   :  { %v200_v0 = vmov 0.0   ;;  %vm201_vm0 = vmmov 0   ;;  %vm54_vm1 = vcmask 261120   ;;  %vm158_vm2 = vcmask 257024   ;;  %s269_s1 = inlined_call_operand.vmem [shape: bf16[32,32], index: 1, kind: input, shape index: {}]   ;;  %s270_s0 = inlined_call_operand.vmem [shape: bf16[16,32], index: 0, kind: input, shape index: {}]   ;;  %s271_s3 = inlined_call_operand.vmem [shape: bf16[16,32], index: 3, kind: input, shape index: {}]   ;;  %s272_s2 = inlined_call_operand.vmem [shape: f32[1,32], index: 2, kind: input, shape index: {}]   ;;  %s273_s4 = inlined_call_operand.vmem [shape: f32[1,32], index: 4, kind: input, shape index: {}]   ;;  %s274_s5 = inlined_call_operand.vmem [shape: f32[1,32], index: 5, kind: input, shape index: {}]   ;;  %s275_s6 = inlined_call_operand.vmem [shape: bf16[16,32], index: 6, kind: output, shape index: {}]  }
   0x1   :  { %183 = vmatprep.subr.bf16.mxu0 %v200_v0  ;;  %v193_v1 = vld [vmem:[%s269_s1 + $0x8] sm:$0xff]   ;;  %187 = vmatprep.mubr.msk.bf16.mxu0 %vm201_vm0, %v200_v0  ;;  %v194_v2 = vld [vmem:[%s269_s1] sm:$0xff]  }
   0x2   :  { %184 = vmatpush3.bf16.msra.mxu0 %v193_v1  ;;  %v195_v3 = vld [vmem:[%s270_s0] sm:$0xff]  }
   0x3   :  { %185 = vmatprep.subr.bf16.mxu0 %v200_v0  ;;  %v177_v4 = vld [vmem:[%s271_s3] sm:$0xff]  }
   0x4   :  { %v165_v5 = vld [vmem:[%s272_s2] ss:$0 sm:$0xff]  ;;  %v178_v6 = vunpack.c.l.bf16 %v177_v4  ;;  %v179_v11 = vunpack.c.h.bf16 %v177_v4 }
   0x5   :  { %v170_v35 = vld [vmem:[%s273_s4] ss:$0 sm:$0xff] }
   0x6   :  { %186 = vmatpush3.bf16.msra.mxu0 %v194_v2  ;;  %v171_v37 = vld [vmem:[%s274_s5] ss:$0 sm:$0xff] }
   0x9   :  { %188 = vmatmul.mubr.msk.bf16.vlgmr.msra.gmra.mxu0 %vm54_vm1, %v195_v3 }
  0xc9   :  { %v92_v7 = vpop.f32.mrf.mxu0 }
  0xca   :  { %v93_v8 = vadd.f32 %v165_v5, %v92_v7 }
  0xcb   :  { %v189_v9 = vpop.f32.mrf.mxu0 }
  0xcc   :  { %v103_v10 = vadd.f32 %v178_v6, %v93_v8 }
  0xcd   :  { %v95_v12 = vpop.f32.mrf.mxu0 }
  0xce   :  { %v96_v13 = vadd.f32 %v165_v5, %v95_v12  ;;  %v105_v14 = vsel %vm54_vm1, %v103_v10, 0.0 }
  0xcf   :  { %106 = vadd.xlane.f32.xlu0 %v105_v14  ;;  %v190_v15 = vpop.f32.mrf.mxu0 }
  0xd0   :  { %v104_v16 = vadd.f32 %v179_v11, %v96_v13 }
  0xd2   :  { %v108_v17 = vsel %vm54_vm1, %v104_v16, 0.0 }
  0xd3   :  { %109 = vadd.xlane.f32.xlu0 %v108_v17 }
 0x158   :  { %v107_v18 = vpop.xlane.xlu0 %106 }
 0x159   :  { %v112_v19 = vmul.f32 0.03125, %v107_v18 }
 0x15b   :  { %v114_v20 = vsub.f32 %v103_v10, %v112_v19 }
 0x15c   :  { %v110_v21 = vpop.xlane.xlu0 %109 }
 0x15d   :  { %v113_v22 = vmul.f32 0.03125, %v110_v21  ;;  %v116_v23 = vmul.f32 %v114_v20, %v114_v20 }
 0x15f   :  { %v115_v24 = vsub.f32 %v104_v16, %v113_v22  ;;  %v118_v25 = vsel %vm54_vm1, %v116_v23, 0.0 }
 0x160   :  { %119 = vadd.xlane.f32.xlu1 %v118_v25 }
 0x161   :  { %v117_v26 = vmul.f32 %v115_v24, %v115_v24 }
 0x163   :  { %v121_v27 = vsel %vm54_vm1, %v117_v26, 0.0 }
 0x164   :  { %122 = vadd.xlane.f32.xlu1 %v121_v27 }
 0x1e9   :  { %v120_v28 = vpop.xlane.xlu1 %119 }
 0x1ea   :  { %v124_v29 = vmul.f32 0.03125, %v120_v28 }
 0x1ec   :  { %v126_v30 = vadd.f32 1e-12, %v124_v29 }
 0x1ed   :  { %v123_v31 = vpop.xlane.xlu1 %122 }
 0x1ee   :  { %196 = vrsqrt.f32 %v126_v30  ;;  %v125_v32 = vmul.f32 0.03125, %v123_v31 }
 0x1f0   :  { %v127_v33 = vadd.f32 1e-12, %v125_v32 }
 0x1f2   :  { %198 = vrsqrt.f32 %v127_v33 }
 0x1fb   :  { %v197_v34 = vpop.eup %196 }
 0x1fc   :  { %v130_v36 = vmul.f32 %v197_v34, %v114_v20 }
 0x1fe   :  { %v139_v38 = vmul.f32 %v170_v35, %v130_v36 }
 0x1ff   :  { %v199_v39 = vpop.eup %198 }
 0x200   :  { %v148_v40 = vadd.f32 %v171_v37, %v139_v38  ;;  %v131_v41 = vmul.f32 %v199_v39, %v115_v24 }
 0x202   :  { %v174_v42 = vpack.c.bf16 %v148_v40, %v148_v40  ;;  %v140_v43 = vmul.f32 %v170_v35, %v131_v41 }
 0x204   :  { %159 = vst.msk [vmem:[%s275_s6] sm:$0xf] %vm158_vm2, %v174_v42  ;;  %v149_v44 = vadd.f32 %v171_v37, %v140_v43 }
 0x206   :  { %v175_v45 = vpack.c.bf16 %v149_v44, %v149_v44 }
 0x208   :  { %160 = vst.msk [vmem:[%s275_s6 + $0x4] sm:$0xf] %vm158_vm2, %v175_v45 }

// kernel: distilbert_classifier_forward.15
= control target key start
LH: loop header
LB: loop body
LE: loop exit
PB: predicated region body
PF: predicated region fallthrough
CT: control target
= control target key end

     0   :  { %s768_s15 = smov 0   ;;  %s770_s16 = smov 0   ;;  %s833_s0 = inlined_call_operand.vmem [shape: bf16[2,8,32], index: 0, kind: input, shape index: {}]   ;;  %s834_s1 = inlined_call_operand.vmem [shape: bf16[2,8,32], index: 1, kind: input, shape index: {}]   ;;  %s835_s2 = inlined_call_operand.vmem [shape: bf16[2,8,32], index: 2, kind: input, shape index: {}]   ;;  %s836_s3 = inlined_call_operand.vmem [shape: f32[2,1,8], index: 3, kind: input, shape index: {}]   ;;  %s837_s4 = inlined_call_operand.vmem [shape: bf16[2,8,32], index: 4, kind: output, shape index: {}]  }
   0x1   :  { %s772_s17 = smov 0  }
   0x2 LB: > { %s26_s18 = sadd.s32 1, %s733_s16  ;;  %p630_p0 = scmp.ge.s32.totalorder %s737_s17, 1  ;;  %s737_s17 = sphi %s772_s17, %s14_s17   ;;  %s733_s16 = sphi %s770_s16, %s839_s16   ;;  %s729_s15 = sphi %s768_s15, %s838_s15  }
   0x3   : > { %p28_p1 = scmp.ge.s32.totalorder %s26_s18, 2  ;;  %p206_p2 = scmp.lt.s32.totalorder %s737_s17, 3 }
   0x5   : > { %s841_s18 = smov (%p28_p1, %s26_s18), 0  ;;  %p207_p3 = pnand %p630_p0, %p206_p2 }
   0x6   : > { %p247_p4 = scmp.lt.s32.totalorder (!%p207_p3), %s729_s15, 1  ;;  %s741_s26 = smov (!%p207_p3), 112  }
   0x7   : > { %210 = sbr.rel (%p207_p3) target bundleno = 1054 (0x41e), region = 36  ;;  %s742_s7 = smov (!%p207_p3), 16  }
   0xc   : > { %v739_v0 = vmov 0.0   ;;  %vm740_vm0 = vmmov 0   ;;  %s843_s15 = smov (!%p247_p4, %s729_s15), 1  ;;  %vm285_vm1 = vcmask 130048   ;;  %vm332_vm2 = vcmask 64512  }
   0xd   : > { %653 = vmatprep.subr.bf16.mxu0 %v739_v0  ;;  %655 = vmatprep.mubr.msk.bf16.mxu0 %vm740_vm0, %v739_v0  ;;  %s788_s19 = sshll.u32 %s843_s15, 2  ;;  %s264_s29 = scalar_lea.vmem %s836_s3, %s843_s15  ;;  %vm346_vm3 = vcmask 1043456   ;;  %vm517_vm4 = vcmask 257024  }
   0xe   : > { %659 = vmatprep.subr.bf16.mxu1 %v739_v0  ;;  %661 = vmatprep.mubr.msk.bf16.mxu1 %vm740_vm0, %v739_v0  ;;  %s257_s22 = scalar_lea.vmem %s834_s1, %s788_s19  ;;  %s253_s25 = scalar_lea.vmem %s833_s0, %s788_s19  ;;  %v635_v6 = vld [vmem:[%s264_s29] ss:$0 sm:$0xff] }
   0xf   : > { %v275_v1 = vld [vmem:[%s257_s22] sm:$0xf]  ;;  %s261_s6 = scalar_lea.vmem %s835_s2, %s788_s19  ;;  %s271_s10 = scalar_lea.vmem %s837_s4, %s788_s19 }
  0x10   : > { %v290_v2 = vsel %vm285_vm1, %v275_v1, 0  ;;  %v274_v3 = vld [vmem:[%s253_s25] sm:$0xf]  ;;  %v639_v15 = vcombine.low %v275_v1, %v275_v1 }
  0x11   : > { %654 = vmatpush3.bf16.xpose.msra.mxu0 %v290_v2  ;;  %v278_v4 = vmul.bf16 1048592000, %v274_v3  ;;  %v276_v13 = vld [vmem:[%s261_s6] sm:$0xf] }
  0x12   : > { %671 = vmatprep.subr.bf16.mxu0 %v739_v0  ;;  %v348_v14 = vsel %vm346_vm3, %v276_v13, 0  ;;  %v641_v16 = vcombine.low %v276_v13, %v276_v13 }
  0x13   : > { %v638_v5 = vcombine.low %v278_v4, %v278_v4  ;;  %660 = vmatpush3.bf16.msra.mxu1 %v348_v14 }
  0x14   : > { %665 = vmatprep.subr.bf16.mxu1 %v739_v0 }
  0x15   : > { %395 = vrot.lane.b32.xlu1 %v638_v5, %s741_s26 }
  0x18   : > { %656 = vmatmul.mubr.msk.bf16.vlgmr.msra.gmra.mxu0 %vm285_vm1, %v278_v4 }
  0x19   : > { %673 = vmatprep.mubr.msk.bf16.mxu0 %vm740_vm0, %v739_v0 }
  0x87   : > { %v396_v24 = vpop.permute.xlu1 %395 }
  0xd8   : > { %v326_v7 = vpop.f32.mrf.mxu0 }
  0xd9   : > { %v327_v8 = vadd.f32 %v635_v6, %v326_v7 }
  0xda   : > { %v657_v9 = vpop.f32.mrf.mxu0 }
  0xdb   : > { %v333_v10 = vsel %vm332_vm2, %v327_v8, -inf }
  0xdc   : > { %334 = vmax.xlane.f32.xlu0 %v333_v10  ;;  %v329_v11 = vpop.f32.mrf.mxu0 }
  0xde   : > { %v658_v12 = vpop.f32.mrf.mxu0 }
  0xf2   : > { %400 = vrot.lane.b32.xlu0 %v639_v15, %s741_s26 }
  0xf6   : > { %461 = vrot.lane.b32.xlu0 %v641_v16, %s741_s26 }
 0x165   : > { %v335_v17 = vpop.xlane.xlu0 %334 }
 0x166   : > { %v336_v18 = vsub.f32 %v327_v8, %v335_v17 }
 0x168   : > { %v337_v19 = vmul.f32 1.442695, %v336_v18 }
 0x169   : > { %v401_v20 = vpop.permute.xlu0 %400 }
 0x16a   : > { %707 = vpow2.f32 %v337_v19  ;;  %v406_v22 = vsel %vm285_vm1, %v401_v20, 0 }
 0x16d   : > { %v462_v36 = vpop.permute.xlu0 %461 }
 0x16e   : > { %v467_v37 = vsel %vm346_vm3, %v462_v36, 0 }
 0x16f   : > { %672 = vmatpush3.bf16.msra.mxu0 %v467_v37 }
 0x177   : > { %v708_v21 = vpop.eup %707 }
 0x178   : > { %v342_v23 = vpack.c.bf16 %v708_v21, %v708_v21  ;;  %v339_v35 = vsel %vm332_vm2, %v708_v21, 0.0 }
 0x17a   : > { %662 = vmatmul.mubr.msk.bf16.vlgmr.msra.gmra.mxu1 %vm332_vm2, %v342_v23 }
 0x17b   : > { %666 = vmatpush3.bf16.xpose.msra.mxu1 %v406_v22  ;;  %667 = vmatprep.mubr.msk.bf16.mxu1 %vm740_vm0, %v739_v0 }
 0x182   : > { %668 = vmatmul.mubr.msk.bf16.vlgmr.msra.gmra.mxu1 %vm285_vm1, %v396_v24 }
 0x23a   : > { %v384_v25 = vpop.f32.mrf.mxu1 }
 0x23c   : > { %v663_v26 = vpop.f32.mrf.mxu1 }
 0x23e   : > { %v387_v27 = vpop.f32.mrf.mxu1 }
 0x240   : > { %v664_v28 = vpop.f32.mrf.mxu1 }
 0x242   : > { %v442_v29 = vpop.f32.mrf.mxu1 }
 0x243   : > { %v443_v30 = vadd.f32 %v635_v6, %v442_v29 }
 0x244   : > { %v669_v31 = vpop.f32.mrf.mxu1 }
 0x245   : > { %v448_v32 = vsel %vm332_vm2, %v443_v30, -inf }
 0x246   : > { %449 = vmax.xlane.f32.xlu1 %v448_v32  ;;  %v445_v33 = vpop.f32.mrf.mxu1 }
 0x248   : > { %v670_v34 = vpop.f32.mrf.mxu1 }
 0x24a   : > { %340 = vadd.xlane.f32.xlu1 %v339_v35 }
 0x2cf   : > { %v450_v38 = vpop.xlane.xlu1 %449 }
 0x2d0   : > { %v451_v39 = vsub.f32 %v443_v30, %v450_v38 }
 0x2d2   : > { %v452_v40 = vmul.f32 1.442695, %v451_v39 }
 0x2d3   : > { %v341_v51 = vpop.xlane.xlu1 %340 }
 0x2d4   : > { %709 = vpow2.f32 %v452_v40 }
 0x2e1   : > { %v710_v41 = vpop.eup %709 }
 0x2e2   : > { %v454_v42 = vsel %vm332_vm2, %v710_v41, 0.0  ;;  %v457_v43 = vpack.c.bf16 %v710_v41, %v710_v41 }
 0x2e3   : > { %455 = vadd.xlane.f32.xlu0 %v454_v42 }
 0x2e4   : > { %674 = vmatmul.mubr.msk.bf16.vlgmr.msra.gmra.mxu0 %vm332_vm2, %v457_v43 }
 0x36c   : > { %v456_v44 = vpop.xlane.xlu0 %455 }
 0x36d   : > { %711 = vrcp.f32 %v456_v44 }
 0x36e   : > { %713 = vrcp.f32 %v341_v51 }
 0x37a   : > { %v712_v45 = vpop.eup %711 }
 0x37b   : > { %v714_v52 = vpop.eup %713 }
 0x37c   : > { %v391_v53 = vmul.f32 %v714_v52, %v384_v25 }
 0x3a4   : > { %v503_v46 = vpop.f32.mrf.mxu0 }
 0x3a5   : > { %v510_v47 = vmul.f32 %v712_v45, %v503_v46 }
 0x3a6   : > { %v675_v48 = vpop.f32.mrf.mxu0 }
 0x3a7   : > { %512 = vrot.lane.b32.xlu1 %v510_v47, %s742_s7 }
 0x3a8   : > { %v506_v49 = vpop.f32.mrf.mxu0 }
 0x3aa   : > { %v676_v50 = vpop.f32.mrf.mxu0 }
 0x419   : > { %v513_v54 = vpop.permute.xlu1 %512 }
 0x41a   : > { %v515_v55 = vsel %vm285_vm1, %v391_v53, %v513_v54 }
 0x41b   : > { %v516_v56 = vpack.c.bf16 %v515_v55, %v515_v55 }
 0x41d   : > { %518 = vst.msk [vmem:[%s271_s10] sm:$0xf] %vm517_vm4, %v516_v56 }
 0x41e PF: > { %s14_s17 = sadd.s32 1, %s737_s17   ;;  %s838_s15 = smov %s733_s16 }
 0x41f   : > { %p11_p5 = scmp.ge.s32.totalorder %s14_s17, 4   ;;  %s839_s16 = smov %s841_s18 }
 0x421   :  { %13 = sbr.rel (!%p11_p5) target bundleno = 2 (0x2), region = 75 }

// kernel: distilbert_classifier_forward.14
= control target key start
LH: loop header
LB: loop body
LE: loop exit
PB: predicated region body
PF: predicated region fallthrough
CT: control target
= control target key end

     0   :  { %v343_v0 = vmov 0.0   ;;  %vm344_vm0 = vmmov 0   ;;  %vm60_vm1 = vcmask 261120   ;;  %vm113_vm2 = vcmask 257024   ;;  %s452_s1 = inlined_call_operand.vmem [shape: bf16[32,32], index: 1, kind: input, shape index: {}]   ;;  %s453_s2 = inlined_call_operand.vmem [shape: bf16[32,32], index: 2, kind: input, shape index: {}]   ;;  %s454_s0 = inlined_call_operand.vmem [shape: bf16[16,32], index: 0, kind: input, shape index: {}]   ;;  %s455_s3 = inlined_call_operand.vmem [shape: bf16[32,32], index: 3, kind: input, shape index: {}]   ;;  %s456_s4 = inlined_call_operand.vmem [shape: f32[1,32], index: 4, kind: input, shape index: {}]   ;;  %s457_s5 = inlined_call_operand.vmem [shape: f32[1,32], index: 5, kind: input, shape index: {}]   ;;  %s458_s7 = inlined_call_operand.vmem [shape: bf16[16,32], index: 7, kind: output, shape index: {0}]   ;;  %s459_s8 = inlined_call_operand.vmem [shape: bf16[16,32], index: 8, kind: output, shape index: {1}]   ;;  %s460_s6 = inlined_call_operand.vmem [shape: f32[1,32], index: 6, kind: input, shape index: {}]   ;;  %s461_s9 = inlined_call_operand.vmem [shape: bf16[16,32], index: 9, kind: output, shape index: {2}]  }
   0x1   :  { %310 = vmatprep.subr.bf16.mxu0 %v343_v0  ;;  %v336_v1 = vld [vmem:[%s452_s1 + $0x8] sm:$0xff]   ;;  %318 = vmatprep.subr.bf16.mxu1 %v343_v0  ;;  %v338_v3 = vld [vmem:[%s452_s1] sm:$0xff]  }
   0x2   :  { %v337_v2 = vld [vmem:[%s453_s2 + $0x8] sm:$0xff]   ;;  %314 = vmatprep.mubr.msk.bf16.mxu0 %vm344_vm0, %v343_v0  ;;  %322 = vmatprep.mubr.msk.bf16.mxu1 %vm344_vm0, %v343_v0  ;;  %v340_v4 = vld [vmem:[%s453_s2] sm:$0xff]  }
   0x3   :  { %311 = vmatpush3.bf16.msra.mxu0 %v336_v1  ;;  %319 = vmatpush3.bf16.msra.mxu1 %v337_v2  ;;  %v339_v5 = vld [vmem:[%s454_s0] sm:$0xff]   ;;  %v341_v6 = vld [vmem:[%s455_s3 + $0x8] sm:$0xff]  }
   0x4   :  { %312 = vmatprep.subr.bf16.mxu0 %v343_v0  ;;  %320 = vmatprep.subr.bf16.mxu1 %v343_v0  ;;  %v342_v7 = vld [vmem:[%s455_s3] sm:$0xff]  }
   0x5   :  { %v276_v8 = vld [vmem:[%s456_s4] ss:$0 sm:$0xff] }
   0x6   :  { %v283_v9 = vld [vmem:[%s457_s5] ss:$0 sm:$0xff] }
   0x7   :  { %313 = vmatpush3.bf16.msra.mxu0 %v338_v3  ;;  %321 = vmatpush3.bf16.msra.mxu1 %v340_v4  ;;  %v289_v23 = vld [vmem:[%s460_s6] ss:$0 sm:$0xff] }
   0x8   :  { %326 = vmatprep.subr.bf16.mxu0 %v343_v0 }
   0xa   :  { %315 = vmatmul.mubr.msk.bf16.vlgmr.msra.gmra.mxu0 %vm60_vm1, %v339_v5  ;;  %323 = vmatmul.mubr.msk.bf16.vlgmr.msra.gmra.mxu1 %vm60_vm1, %v339_v5 }
   0xb   :  { %327 = vmatpush3.bf16.msra.mxu0 %v341_v6  ;;  %330 = vmatprep.mubr.msk.bf16.mxu0 %vm344_vm0, %v343_v0 }
   0xc   :  { %328 = vmatprep.subr.bf16.mxu0 %v343_v0 }
   0xf   :  { %329 = vmatpush3.bf16.msra.mxu0 %v342_v7 }
  0x12   :  { %331 = vmatmul.mubr.msk.bf16.vlgmr.msra.gmra.mxu0 %vm60_vm1, %v339_v5 }
  0xca   :  { %v98_v10 = vpop.f32.mrf.mxu0  ;;  %v173_v12 = vpop.f32.mrf.mxu1 }
  0xcb   :  { %v99_v11 = vadd.f32 %v276_v8, %v98_v10  ;;  %v174_v14 = vadd.f32 %v283_v9, %v173_v12 }
  0xcc   :  { %v316_v13 = vpop.f32.mrf.mxu0  ;;  %v324_v16 = vpop.f32.mrf.mxu1 }
  0xcd   :  { %v295_v15 = vpack.c.bf16 %v99_v11, %v99_v11  ;;  %v297_v17 = vpack.c.bf16 %v174_v14, %v174_v14 }
  0xce   :  { %v101_v18 = vpop.f32.mrf.mxu0  ;;  %v176_v20 = vpop.f32.mrf.mxu1 }
  0xcf   :  { %114 = vst.msk [vmem:[%s458_s7] sm:$0xf] %vm113_vm2, %v295_v15  ;;  %v102_v19 = vadd.f32 %v276_v8, %v101_v18  ;;  %188 = vst.msk [vmem:[%s459_s8] sm:$0xf] %vm113_vm2, %v297_v17  ;;  %v177_v22 = vadd.f32 %v283_v9, %v176_v20 }
  0xd0   :  { %v317_v21 = vpop.f32.mrf.mxu0  ;;  %v325_v25 = vpop.f32.mrf.mxu1 }
  0xd1   :  { %v296_v24 = vpack.c.bf16 %v102_v19, %v102_v19  ;;  %v298_v26 = vpack.c.bf16 %v177_v22, %v177_v22 }
  0xd2   :  { %v247_v27 = vpop.f32.mrf.mxu0 }
  0xd3   :  { %115 = vst.msk [vmem:[%s458_s7 + $0x4] sm:$0xf] %vm113_vm2, %v296_v24  ;;  %v248_v28 = vadd.f32 %v289_v23, %v247_v27  ;;  %189 = vst.msk [vmem:[%s459_s8 + $0x4] sm:$0xf] %vm113_vm2, %v298_v26 }
  0xd4   :  { %v332_v29 = vpop.f32.mrf.mxu0 }
  0xd5   :  { %v299_v30 = vpack.c.bf16 %v248_v28, %v248_v28 }
  0xd6   :  { %v250_v31 = vpop.f32.mrf.mxu0 }
  0xd7   :  { %262 = vst.msk [vmem:[%s461_s9] sm:$0xf] %vm113_vm2, %v299_v30  ;;  %v251_v32 = vadd.f32 %v289_v23, %v250_v31 }
  0xd8   :  { %v333_v33 = vpop.f32.mrf.mxu0 }
  0xd9   :  { %v300_v34 = vpack.c.bf16 %v251_v32, %v251_v32 }
  0xdb   :  { %263 = vst.msk [vmem:[%s461_s9 + $0x4] sm:$0xf] %vm113_vm2, %v300_v34 }

// kernel: distilbert_classifier_forward.17
= control target key start
LH: loop header
LB: loop body
LE: loop exit
PB: predicated region body
PF: predicated region fallthrough
CT: control target
= control target key end

     0   :  { %v152_v0 = vmov 0.0   ;;  %vm153_vm0 = vmmov 0   ;;  %vm45_vm1 = vcmask 261120   ;;  %vm116_vm2 = vcmask 519168   ;;  %s192_s1 = inlined_call_operand.vmem [shape: bf16[32,64], index: 1, kind: input, shape index: {}]   ;;  %s193_s0 = inlined_call_operand.vmem [shape: bf16[16,32], index: 0, kind: input, shape index: {}]   ;;  %s194_s2 = inlined_call_operand.vmem [shape: f32[1,64], index: 2, kind: input, shape index: {}]   ;;  %s195_s3 = inlined_call_operand.vmem [shape: bf16[16,64], index: 3, kind: output, shape index: {}]  }
   0x1   :  { %135 = vmatprep.subr.bf16.mxu0 %v152_v0  ;;  %v145_v1 = vld [vmem:[%s192_s1 + $0x8] sm:$0xff]   ;;  %139 = vmatprep.mubr.msk.bf16.mxu0 %vm153_vm0, %v152_v0  ;;  %v146_v2 = vld [vmem:[%s192_s1] sm:$0xff]  }
   0x2   :  { %136 = vmatpush3.bf16.msra.mxu0 %v145_v1  ;;  %v147_v3 = vld [vmem:[%s193_s0] sm:$0xff]  }
   0x3   :  { %137 = vmatprep.subr.bf16.mxu0 %v152_v0  ;;  %v123_v4 = vld [vmem:[%s194_s2] ss:$0 sm:$0xff] }
   0x6   :  { %138 = vmatpush3.bf16.msra.mxu0 %v146_v2 }
   0x9   :  { %140 = vmatmul.mubr.msk.bf16.vlgmr.msra.gmra.mxu0 %vm45_vm1, %v147_v3 }
  0xc9   :  { %v83_v5 = vpop.f32.mrf.mxu0 }
  0xca   :  { %v84_v6 = vadd.f32 %v123_v4, %v83_v5 }
  0xcb   :  { %v141_v7 = vpop.f32.mrf.mxu0 }
  0xcc   :  { %v92_v8 = vmul.f32 0.044715, %v84_v6  ;;  %v90_v22 = vmul.f32 0.5, %v84_v6 }
  0xcd   :  { %v86_v9 = vpop.f32.mrf.mxu0 }
  0xce   :  { %v94_v10 = vmul.f32 %v92_v8, %v84_v6  ;;  %v87_v11 = vadd.f32 %v123_v4, %v86_v9 }
  0xcf   :  { %v142_v12 = vpop.f32.mrf.mxu0 }
  0xd0   :  { %v96_v13 = vmul.f32 %v94_v10, %v84_v6  ;;  %v93_v14 = vmul.f32 0.044715, %v87_v11  ;;  %v91_v27 = vmul.f32 0.5, %v87_v11 }
  0xd2   :  { %v98_v15 = vadd.f32 %v96_v13, %v84_v6  ;;  %v95_v16 = vmul.f32 %v93_v14, %v87_v11 }
  0xd4   :  { %v100_v17 = vmul.f32 0.7978846, %v98_v15  ;;  %v97_v18 = vmul.f32 %v95_v16, %v87_v11 }
  0xd6   :  { %148 = vtanh.f32 %v100_v17  ;;  %v99_v19 = vadd.f32 %v97_v18, %v87_v11 }
  0xd8   :  { %v101_v20 = vmul.f32 0.7978846, %v99_v19 }
  0xda   :  { %150 = vtanh.f32 %v101_v20 }
  0xe3   :  { %v149_v21 = vpop.eup %148 }
  0xe4   :  { %v104_v23 = vadd.f32 1.0, %v149_v21 }
  0xe6   :  { %v106_v24 = vmul.f32 %v104_v23, %v90_v22 }
  0xe7   :  { %v151_v25 = vpop.eup %150 }
  0xe8   :  { %v130_v26 = vpack.c.bf16 %v106_v24, %v106_v24  ;;  %v105_v28 = vadd.f32 1.0, %v151_v25 }
  0xea   :  { %117 = vst.msk [vmem:[%s195_s3] sm:$0xf] %vm116_vm2, %v130_v26  ;;  %v107_v29 = vmul.f32 %v105_v28, %v91_v27 }
  0xec   :  { %v131_v30 = vpack.c.bf16 %v107_v29, %v107_v29 }
  0xee   :  { %118 = vst.msk [vmem:[%s195_s3 + $0x4] sm:$0xf] %vm116_vm2, %v131_v30 }

// kernel: distilbert_classifier_forward.18
= control target key start
LH: loop header
LB: loop body
LE: loop exit
PB: predicated region body
PF: predicated region fallthrough
CT: control target
= control target key end

     0   :  { %v227_v0 = vmov 0.0   ;;  %vm228_vm0 = vmmov 0   ;;  %vm70_vm1 = vcmask 523264   ;;  %vm121_vm2 = vcmask 261120   ;;  %s301_s1 = inlined_call_operand.vmem [shape: bf16[64,32], index: 1, kind: input, shape index: {}]   ;;  %s302_s0 = inlined_call_operand.vmem [shape: bf16[16,64], index: 0, kind: input, shape index: {}]   ;;  %s303_s3 = inlined_call_operand.vmem [shape: bf16[16,32], index: 3, kind: input, shape index: {}]   ;;  %s304_s2 = inlined_call_operand.vmem [shape: f32[1,32], index: 2, kind: input, shape index: {}]   ;;  %s305_s4 = inlined_call_operand.vmem [shape: f32[1,32], index: 4, kind: input, shape index: {}]   ;;  %s306_s5 = inlined_call_operand.vmem [shape: f32[1,32], index: 5, kind: input, shape index: {}]   ;;  %s307_s6 = inlined_call_operand.vmem [shape: bf16[16,32], index: 6, kind: output, shape index: {}]  }
   0x1   :  { %204 = vmatprep.subr.bf16.mxu0 %v227_v0  ;;  %v218_v1 = vld [vmem:[%s301_s1 + $0x18] sm:$0xff]   ;;  %212 = vmatprep.mubr.msk.bf16.mxu0 %vm228_vm0, %v227_v0  ;;  %v219_v2 = vld [vmem:[%s301_s1 + $0x10] sm:$0xff]   ;;  %v220_v3 = vld [vmem:[%s301_s1 + $0x8] sm:$0xff]   ;;  %vm175_vm3 = vcmask 257024  }
   0x2   :  { %205 = vmatpush3.bf16.msra.mxu0 %v218_v1  ;;  %v221_v4 = vld [vmem:[%s301_s1] sm:$0xff]  }
   0x3   :  { %206 = vmatprep.subr.bf16.mxu0 %v227_v0  ;;  %v222_v5 = vld [vmem:[%s302_s0] sm:$0xff]  }
   0x4   :  { %v196_v6 = vld [vmem:[%s303_s3] sm:$0xff]  }
   0x5   :  { %v182_v7 = vld [vmem:[%s304_s2] ss:$0 sm:$0xff]  ;;  %v197_v8 = vunpack.c.l.bf16 %v196_v6  ;;  %v198_v13 = vunpack.c.h.bf16 %v196_v6 }
   0x6   :  { %207 = vmatpush3.bf16.msra.mxu0 %v219_v2  ;;  %v189_v37 = vld [vmem:[%s305_s4] ss:$0 sm:$0xff] }
   0x7   :  { %208 = vmatprep.subr.bf16.mxu0 %v227_v0  ;;  %v190_v39 = vld [vmem:[%s306_s5] ss:$0 sm:$0xff] }
   0xa   :  { %209 = vmatpush3.bf16.msra.mxu0 %v220_v3 }
   0xb   :  { %210 = vmatprep.subr.bf16.mxu0 %v227_v0 }
   0xe   :  { %211 = vmatpush3.bf16.msra.mxu0 %v221_v4 }
  0x11   :  { %213 = vmatmul.mubr.msk.bf16.vlgmr.msra.gmra.mxu0 %vm70_vm1, %v222_v5 }
  0xd1   :  { %v108_v9 = vpop.f32.mrf.mxu0 }
  0xd2   :  { %v109_v10 = vadd.f32 %v182_v7, %v108_v9 }
  0xd3   :  { %v214_v11 = vpop.f32.mrf.mxu0 }
  0xd4   :  { %v119_v12 = vadd.f32 %v197_v8, %v109_v10 }
  0xd5   :  { %v111_v14 = vpop.f32.mrf.mxu0 }
  0xd6   :  { %v112_v15 = vadd.f32 %v182_v7, %v111_v14  ;;  %v122_v16 = vsel %vm121_vm2, %v119_v12, 0.0 }
  0xd7   :  { %123 = vadd.xlane.f32.xlu0 %v122_v16  ;;  %v215_v17 = vpop.f32.mrf.mxu0 }
  0xd8   :  { %v120_v18 = vadd.f32 %v198_v13, %v112_v15 }
  0xda   :  { %v125_v19 = vsel %vm121_vm2, %v120_v18, 0.0 }
  0xdb   :  { %126 = vadd.xlane.f32.xlu0 %v125_v19 }
 0x160   :  { %v124_v20 = vpop.xlane.xlu0 %123 }
 0x161   :  { %v129_v21 = vmul.f32 0.03125, %v124_v20 }
 0x163   :  { %v131_v22 = vsub.f32 %v119_v12, %v129_v21 }
 0x164   :  { %v127_v23 = vpop.xlane.xlu0 %126 }
 0x165   :  { %v130_v24 = vmul.f32 0.03125, %v127_v23  ;;  %v133_v25 = vmul.f32 %v131_v22, %v131_v22 }
 0x167   :  { %v132_v26 = vsub.f32 %v120_v18, %v130_v24  ;;  %v135_v27 = vsel %vm121_vm2, %v133_v25, 0.0 }
 0x168   :  { %136 = vadd.xlane.f32.xlu1 %v135_v27 }
 0x169   :  { %v134_v28 = vmul.f32 %v132_v26, %v132_v26 }
 0x16b   :  { %v138_v29 = vsel %vm121_vm2, %v134_v28, 0.0 }
 0x16c   :  { %139 = vadd.xlane.f32.xlu1 %v138_v29 }
 0x1f1   :  { %v137_v30 = vpop.xlane.xlu1 %136 }
 0x1f2   :  { %v141_v31 = vmul.f32 0.03125, %v137_v30 }
 0x1f4   :  { %v143_v32 = vadd.f32 1e-12, %v141_v31 }
 0x1f5   :  { %v140_v33 = vpop.xlane.xlu1 %139 }
 0x1f6   :  { %223 = vrsqrt.f32 %v143_v32  ;;  %v142_v34 = vmul.f32 0.03125, %v140_v33 }
 0x1f8   :  { %v144_v35 = vadd.f32 1e-12, %v142_v34 }
 0x1fa   :  { %225 = vrsqrt.f32 %v144_v35 }
 0x203   :  { %v224_v36 = vpop.eup %223 }
 0x204   :  { %v147_v38 = vmul.f32 %v224_v36, %v131_v22 }
 0x206   :  { %v156_v40 = vmul.f32 %v189_v37, %v147_v38 }
 0x207   :  { %v226_v41 = vpop.eup %225 }
 0x208   :  { %v165_v42 = vadd.f32 %v190_v39, %v156_v40  ;;  %v148_v43 = vmul.f32 %v226_v41, %v132_v26 }
 0x20a   :  { %v193_v44 = vpack.c.bf16 %v165_v42, %v165_v42  ;;  %v157_v45 = vmul.f32 %v189_v37, %v148_v43 }
 0x20c   :  { %176 = vst.msk [vmem:[%s307_s6] sm:$0xf] %vm175_vm3, %v193_v44  ;;  %v166_v46 = vadd.f32 %v190_v39, %v157_v45 }
 0x20e   :  { %v194_v47 = vpack.c.bf16 %v166_v46, %v166_v46 }
 0x210   :  { %177 = vst.msk [vmem:[%s307_s6 + $0x4] sm:$0xf] %vm175_vm3, %v194_v47 }

// kernel: distilbert_classifier_forward.25
= control target key start
LH: loop header
LB: loop body
LE: loop exit
PB: predicated region body
PF: predicated region fallthrough
CT: control target
= control target key end

     0   :  { %v142_v1 = vmov 0.0   ;;  %vm143_vm0 = vmmov 0   ;;  %s180_s0 = inlined_call_operand.vmem [shape: bf16[2,32], index: 0, kind: input, shape index: {}]   ;;  %s181_s1 = inlined_call_operand.vmem [shape: bf16[32,3], index: 1, kind: input, shape index: {}]   ;;  %s182_s2 = inlined_call_operand.vmem [shape: f32[1,3], index: 2, kind: input, shape index: {}]   ;;  %s183_s3 = inlined_call_operand.hbm [shape: f32[2,3], index: 3, kind: output, shape index: {}]  }
   0x1   :  { %v118_v0 = vld [vmem:[%s181_s1 + $0x8] sm:$0xff]   ;;  %107 = vmatprep.subr.bf16.mxu0 %v142_v1  ;;  %v119_v2 = vld [vmem:[%s181_s1] sm:$0xff]   ;;  %111 = vmatprep.mubr.msk.bf16.mxu0 %vm143_vm0, %v142_v1 }
   0x2   :  { %108 = vmatpush3.bf16.msra.mxu0 %v118_v0 }
   0x3   :  { %109 = vmatprep.subr.bf16.mxu0 %v142_v1 }
   0x4   :  { %8 = vsyncpa [#allocation3], 0  ;;  %v16_v3 = vld [vmem:[%s180_s0] sm:$0x1]  ;;  %vm40_vm1 = vcmask 261120   ;;  %s144_s20 = smov [#allocation2]  }
   0x5   :  { %v100_v4 = vld [vmem:[%s182_s2] ss:$0 sm:$0xff]  ;;  %s92_s21 = sshll.u32 %s144_s20, 4  ;;  %vm84_vm2 = vcmask 17408   ;;  %s93_s21 = int_to_ptr.vmem [resolvable:$true] %s92_s21 }
   0x6   :  { %110 = vmatpush3.bf16.msra.mxu0 %v119_v2  ;;  %s120_s1 = scalar_lea.vmem %s93_s21, 32  ;;  %p125_p1 = scmp.lt.s32.totalorder %s93_s21, %s93_s21 }
   0x7   :  { %p121_p0 = scmp.ne.s32.totalorder %s93_s21, %s120_s1  ;;  %p126_p2 = scmp.lt.s32.totalorder %s120_s1, %s120_s1 }
   0x9   :  { %112 = vmatmul.mubr.msk.bf16.vlgmr.msra.gmra.mxu0 %vm40_vm1, %v16_v3  ;;  %p127_p3 = por %p126_p2, %p125_p1 }
   0xb   :  { %p128_p4 = pnand %p127_p3, %p121_p0 }
  0xc9   :  { %v78_v5 = vpop.f32.mrf.mxu0 }
  0xca   :  { %v79_v6 = vadd.f32 %v100_v4, %v78_v5 }
  0xcb   :  { %v113_v7 = vpop.f32.mrf.mxu0 }
  0xcc   :  { %85 = vst.msk [vmem:[#allocation2] sm:$0x3] %vm84_vm2, %v79_v6 }
  0xcd   :  { %v81_v8 = vpop.f32.mrf.mxu0 }
  0xce   :  { %131 = shalt.err (!%p128_p4)
}
  0xcf   :  { %95 = dma.vmem_to_hbm [thread:$0]  %s93_s21, 32, %s183_s3, [#allocation3]   ;;  %v114_v9 = vpop.f32.mrf.mxu0 }
  0xd0   :  { %140 = dma.done.wait [#allocation3], 32  }
  0xd1   :  { %141 = vsyncadd [#allocation3], 4294967264 }
  0xd2   :  { %99 = vsyncpa [#allocation3], 1 }

// kernel: distilbert_classifier_forward.24
= control target key start
LH: loop header
LB: loop body
LE: loop exit
PB: predicated region body
PF: predicated region fallthrough
CT: control target
= control target key end

     0   :  { %v110_v0 = vmov 0.0   ;;  %vm111_vm0 = vmmov 0   ;;  %vm39_vm1 = vcmask 261120   ;;  %vm85_vm2 = vcmask 253952   ;;  %s147_s1 = inlined_call_operand.vmem [shape: bf16[32,32], index: 1, kind: input, shape index: {}]   ;;  %s148_s0 = inlined_call_operand.vmem [shape: bf16[2,32], index: 0, kind: input, shape index: {}]   ;;  %s149_s2 = inlined_call_operand.vmem [shape: f32[1,32], index: 2, kind: input, shape index: {}]   ;;  %s150_s3 = inlined_call_operand.vmem [shape: bf16[2,32], index: 3, kind: output, shape index: {}]  }
   0x1   :  { %98 = vmatprep.subr.bf16.mxu0 %v110_v0  ;;  %v108_v1 = vld [vmem:[%s147_s1 + $0x8] sm:$0xff]   ;;  %102 = vmatprep.mubr.msk.bf16.mxu0 %vm111_vm0, %v110_v0  ;;  %v109_v2 = vld [vmem:[%s147_s1] sm:$0xff]  }
   0x2   :  { %99 = vmatpush3.bf16.msra.mxu0 %v108_v1  ;;  %v15_v3 = vld [vmem:[%s148_s0] sm:$0x1] }
   0x3   :  { %100 = vmatprep.subr.bf16.mxu0 %v110_v0  ;;  %v91_v4 = vld [vmem:[%s149_s2] ss:$0 sm:$0xff] }
   0x6   :  { %101 = vmatpush3.bf16.msra.mxu0 %v109_v2 }
   0x9   :  { %103 = vmatmul.mubr.msk.bf16.vlgmr.msra.gmra.mxu0 %vm39_vm1, %v15_v3 }
  0xc9   :  { %v77_v5 = vpop.f32.mrf.mxu0 }
  0xca   :  { %v78_v6 = vadd.f32 %v91_v4, %v77_v5 }
  0xcb   :  { %v104_v7 = vpop.f32.mrf.mxu0 }
  0xcc   :  { %v83_v8 = vmax.f32 %v78_v6, 0.0 }
  0xcd   :  { %v80_v9 = vpop.f32.mrf.mxu0 }
  0xce   :  { %v84_v10 = vpack.c.bf16 %v83_v8, %v83_v8 }
  0xcf   :  { %v105_v11 = vpop.f32.mrf.mxu0 }
  0xd0   :  { %86 = vst.msk [vmem:[%s150_s3] sm:$0x1] %vm85_vm2, %v84_v10 }

</bundles_post_ra>
